<compile_context>
chip_gen: v7x
topology: tpu7x:2x2x1
jax: 0.10.0
libtpu: 0.0.40
codegen_flags: <defaults>
</compile_context>

<pallas_src>
import functools

import jax
import jax.numpy as jnp
from jax.experimental import pallas as pl
from jax.experimental.pallas import tpu as pltpu

LANE = 128


def _round_up(v, m):
    return (v + m - 1) // m * m


def _gated_sum_kernel(pos_i_ref, pos_t_ref, bcol_ref, browk_ref, browi_ref,
                      x_ref, w1v_ref, w1g_ref, b1v_ref, b1g_ref, w2_ref, b2_ref,
                      out_ref, acc_ref, *, num_graphs, inv_two_sigma2, r2):
    k = pl.program_id(1)

    @pl.when(k == 0)
    def _():
        acc_ref[...] = jnp.zeros_like(acc_ref)

    # ---- radial point-conv tile: adjacency built on-chip (no O(N^2) HBM operand) ----
    pi = pos_i_ref[...]                                    # [TM, 8] f32 (xyz zero-padded)
    pt = pos_t_ref[...]                                    # [8, TK] f32
    ni = jnp.sum(pi * pi, axis=1, keepdims=True)           # [TM, 1]
    nj = jnp.sum(pt * pt, axis=0, keepdims=True)           # [1, TK]
    cross = jnp.dot(pi, pt, preferred_element_type=jnp.float32)   # [TM, TK]
    d2 = jnp.maximum(ni + nj - 2.0 * cross, 0.0)

    same = bcol_ref[...] == browk_ref[...]                 # [TM, TK] same-graph mask
    mask = jnp.logical_and(same, d2 <= r2)
    adj = jnp.where(mask, jnp.exp(-d2 * inv_two_sigma2), 0.0)

    # message passing: m_i += sum_j R(|r_i - r_j|) x_j   (bf16 MXU, f32 accumulate)
    acc_ref[...] += jnp.dot(adj.astype(jnp.bfloat16), x_ref[...],
                            preferred_element_type=jnp.float32)

    # ---- epilogue at last reduction step: gate, output linear, per-graph segment sum ----
    @pl.when(k == pl.num_programs(1) - 1)
    def _():
        m = acc_ref[...].astype(jnp.bfloat16)              # [TM, C_in_pad]
        hv = jnp.dot(m, w1v_ref[...], preferred_element_type=jnp.float32) + b1v_ref[...]
        hg = jnp.dot(m, w1g_ref[...], preferred_element_type=jnp.float32) + b1g_ref[...]
        a = hv * jax.nn.sigmoid(hg)                        # padded lanes: 0 * 0.5 = 0
        o = jnp.dot(a.astype(jnp.bfloat16), w2_ref[...],
                    preferred_element_type=jnp.float32) + b2_ref[...]   # [TM, C_out_pad]
        # scatter_add over batch for this row tile: one-hot built on the VPU
        tm = o.shape[0]
        gid = jax.lax.broadcasted_iota(jnp.int32, (num_graphs, tm), 0)
        onehot = (gid == browi_ref[...]).astype(jnp.float32)            # [G, TM]
        out_ref[...] = jnp.dot(onehot, o, preferred_element_type=jnp.float32)[None]


def sum_network_forward(x, pos, batch, params, num_graphs,
                        gauss_sigma=1.0, r_max=2.5, tm=128, tk=128):
    """Glue (padding / transposition) in JAX; the whole hot path is one Pallas kernel."""
    w1, b1, w2, b2 = params
    n, c_in = x.shape
    c_hid, c_out = w2.shape
    assert n % tm == 0 and n % tk == 0, "pad N to a multiple of the tile sizes"

    c_in_p = _round_up(c_in, LANE)
    c_hid_p = _round_up(c_hid, LANE)
    c_out_p = _round_up(c_out, LANE)

    # Lane-dense, zero-padded operands.  w1/b1 split into (values, gates) halves.
    x_p = jnp.zeros((n, c_in_p), jnp.bfloat16).at[:, :c_in].set(x.astype(jnp.bfloat16))
    w1v = jnp.zeros((c_in_p, c_hid_p), jnp.bfloat16).at[:c_in, :c_hid].set(
        w1[:, :c_hid].astype(jnp.bfloat16))
    w1g = jnp.zeros((c_in_p, c_hid_p), jnp.bfloat16).at[:c_in, :c_hid].set(
        w1[:, c_hid:].astype(jnp.bfloat16))
    b1v = jnp.zeros((1, c_hid_p), jnp.float32).at[:, :c_hid].set(b1[:, :c_hid])
    b1g = jnp.zeros((1, c_hid_p), jnp.float32).at[:, :c_hid].set(b1[:, c_hid:])
    w2p = jnp.zeros((c_hid_p, c_out_p), jnp.bfloat16).at[:c_hid, :c_out].set(
        w2.astype(jnp.bfloat16))
    b2p = jnp.zeros((1, c_out_p), jnp.float32).at[:, :c_out].set(b2)

    pos_p = jnp.zeros((n, 8), jnp.float32).at[:, :3].set(pos)   # xyz padded to 8 cols
    pos_t = pos_p.T                                             # [8, N]
    batch = batch.astype(jnp.int32)
    bcol = batch[:, None]                                       # [N, 1]
    brow = batch[None, :]                                       # [1, N]

    n_i = n // tm
    n_k = n // tk

    kernel = functools.partial(
        _gated_sum_kernel,
        num_graphs=num_graphs,
        inv_two_sigma2=1.0 / (2.0 * gauss_sigma * gauss_sigma),
        r2=r_max * r_max)

    resident = lambda i, k: (0, 0)   # weights/biases loaded once, pinned in VMEM

    out_partial = pl.pallas_call(
        kernel,
        out_shape=jax.ShapeDtypeStruct((n_i, num_graphs, c_out_p), jnp.float32),
        grid_spec=pltpu.PrefetchScalarGridSpec(
            num_scalar_prefetch=0,
            grid=(n_i, n_k),
            in_specs=[
                pl.BlockSpec((tm, 8), lambda i, k: (i, 0)),        # pos, row tile
                pl.BlockSpec((8, tk), lambda i, k: (0, k)),        # pos^T, col tile
                pl.BlockSpec((tm, 1), lambda i, k: (i, 0)),        # batch id, rows
                pl.BlockSpec((1, tk), lambda i, k: (0, k)),        # batch id, cols
                pl.BlockSpec((1, tm), lambda i, k: (0, i)),        # batch id for segment sum
                pl.BlockSpec((tk, c_in_p), lambda i, k: (k, 0)),   # x, neighbour tile
                pl.BlockSpec((c_in_p, c_hid_p), resident),         # w1 (values half)
                pl.BlockSpec((c_in_p, c_hid_p), resident),         # w1 (gates half)
                pl.BlockSpec((1, c_hid_p), resident),              # b1 (values half)
                pl.BlockSpec((1, c_hid_p), resident),              # b1 (gates half)
                pl.BlockSpec((c_hid_p, c_out_p), resident),        # w2
                pl.BlockSpec((1, c_out_p), resident),              # b2
            ],
            out_specs=pl.BlockSpec((1, num_graphs, c_out_p), lambda i, k: (i, 0, 0)),
            scratch_shapes=[pltpu.VMEM((tm, c_in_p), jnp.float32)],
        ),
        compiler_params=pltpu.CompilerParams(
            dimension_semantics=("parallel", "arbitrary")),
    )(pos_p, pos_t, bcol, brow, brow, x_p, w1v, w1g, b1v, b1g, w2p, b2p)

    # per-row-tile partial graph sums -> final scatter_add result (tiny reduction)
    return jnp.sum(out_partial, axis=0)[:, :c_out]


def _reference(x, pos, batch, params, num_graphs, gauss_sigma=1.0, r_max=2.5):
    """Pure-JAX f32 reference of the original module semantics."""
    w1, b1, w2, b2 = params
    c_hid = w2.shape[0]
    d2 = jnp.sum((pos[:, None, :] - pos[None, :, :]) ** 2, axis=-1)
    same = (batch[:, None] == batch[None, :]).astype(jnp.float32)
    cutoff = (d2 <= r_max * r_max).astype(jnp.float32)
    adj = jnp.exp(-d2 / (2.0 * gauss_sigma * gauss_sigma)) * same * cutoff
    m = adj @ x
    h = m @ w1 + b1
    a = h[:, :c_hid] * jax.nn.sigmoid(h[:, c_hid:])
    o = a @ w2 + b2
    onehot_t = jax.nn.one_hot(batch, num_graphs, dtype=jnp.float32).T
    return onehot_t @ o


if __name__ == "__main__":
    # Tetris-like setup, sized so the grid actually has >1 tile on both axes.
    G = 8            # number of graphs
    PTS = 32         # points per graph
    N = G * PTS      # 256 total points -> grid = (2, 2) with 128-point tiles
    C_IN = 8
    C_HID = 16
    C_OUT = 8

    key = jax.random.PRNGKey(0)
    k_x, k_pos, k_w1, k_b1, k_w2, k_b2 = jax.random.split(key, 6)

    x = jax.random.normal(k_x, (N, C_IN), dtype=jnp.float32)
    pos = jax.random.normal(k_pos, (N, 3), dtype=jnp.float32)
    batch = jnp.repeat(jnp.arange(G, dtype=jnp.int32), PTS)  # [N]

    w1 = jax.random.normal(k_w1, (C_IN, 2 * C_HID), dtype=jnp.float32) / jnp.sqrt(C_IN)
    b1 = 0.1 * jax.random.normal(k_b1, (1, 2 * C_HID), dtype=jnp.float32)
    w2 = jax.random.normal(k_w2, (C_HID, C_OUT), dtype=jnp.float32) / jnp.sqrt(C_HID)
    b2 = 0.1 * jax.random.normal(k_b2, (1, C_OUT), dtype=jnp.float32)
    params = (w1, b1, w2, b2)

    out = jax.block_until_ready(sum_network_forward(x, pos, batch, params, G))
    ref = jax.block_until_ready(_reference(x, pos, batch, params, G))

    assert out.shape == (G, C_OUT)
    # bf16 matmul operands (f32 accumulation) -> compare norm-relative to f32 reference.
    rel_err = jnp.linalg.norm(out - ref) / jnp.linalg.norm(ref)
    assert rel_err < 3e-2, f"mismatch vs JAX reference (rel_err={rel_err})"

    print("KERNEL_OK")
</pallas_src>

<mosaic_0001>
module attributes {stable_mosaic.version = 11 : i64} {
  func.func @_gated_sum_kernel(%arg0: i32, %arg1: i32, %arg2: memref<128x8xf32, #tpu.memory_space<vmem>>, %arg3: memref<8x128xf32, #tpu.memory_space<vmem>>, %arg4: memref<128x1xi32, #tpu.memory_space<vmem>>, %arg5: memref<1x128xi32, #tpu.memory_space<vmem>>, %arg6: memref<1x128xi32, #tpu.memory_space<vmem>>, %arg7: memref<128x128xbf16, #tpu.memory_space<vmem>>, %arg8: memref<128x128xbf16, #tpu.memory_space<vmem>>, %arg9: memref<128x128xbf16, #tpu.memory_space<vmem>>, %arg10: memref<1x128xf32, #tpu.memory_space<vmem>>, %arg11: memref<1x128xf32, #tpu.memory_space<vmem>>, %arg12: memref<128x128xbf16, #tpu.memory_space<vmem>>, %arg13: memref<1x128xf32, #tpu.memory_space<vmem>>, %arg14: memref<1x8x128xf32, #tpu.memory_space<vmem>>, %arg15: memref<128x128xf32, #tpu.memory_space<vmem>>) attributes {dimension_semantics = [#tpu.dimension_semantics<parallel>, #tpu.dimension_semantics<arbitrary>], iteration_bounds = array<i64: 2, 2>, scalar_prefetch = 0 : i64, scratch_operands = 1 : i64, tpu.core_type = #tpu.core_type<tc>, window_params = [{transform_indices = @transform_0, window_bounds = array<i64: 128, 8>}, {transform_indices = @transform_1, window_bounds = array<i64: 8, 128>}, {transform_indices = @transform_2, window_bounds = array<i64: 128, 1>}, {transform_indices = @transform_3, window_bounds = array<i64: 1, 128>}, {transform_indices = @transform_4, window_bounds = array<i64: 1, 128>}, {transform_indices = @transform_5, window_bounds = array<i64: 128, 128>}, {pipeline_mode = #tpu.pipeline_mode<synchronous>, transform_indices = @transform_6, window_bounds = array<i64: 128, 128>}, {pipeline_mode = #tpu.pipeline_mode<synchronous>, transform_indices = @transform_7, window_bounds = array<i64: 128, 128>}, {pipeline_mode = #tpu.pipeline_mode<synchronous>, transform_indices = @transform_8, window_bounds = array<i64: 1, 128>}, {pipeline_mode = #tpu.pipeline_mode<synchronous>, transform_indices = @transform_9, window_bounds = array<i64: 1, 128>}, {pipeline_mode = #tpu.pipeline_mode<synchronous>, transform_indices = @transform_10, window_bounds = array<i64: 128, 128>}, {pipeline_mode = #tpu.pipeline_mode<synchronous>, transform_indices = @transform_11, window_bounds = array<i64: 1, 128>}, {transform_indices = @transform_12, window_bounds = array<i64: 1, 8, 128>}]} {
    %c0_i32 = arith.constant 0 : i32
    %0 = arith.cmpi eq, %arg1, %c0_i32 : i32
    %1 = arith.extui %0 : i1 to i32
    %c0_i32_0 = arith.constant 0 : i32
    %2 = arith.cmpi ne, %1, %c0_i32_0 : i32
    scf.if %2 {
      %cst_24 = arith.constant 0.000000e+00 : f32
      %44 = vector.broadcast %cst_24 : f32 to vector<128x128xf32>
      %c0_25 = arith.constant 0 : index
      %c0_26 = arith.constant 0 : index
      %45 = vector.load %arg15[%c0_25, %c0_26] : memref<128x128xf32, #tpu.memory_space<vmem>>, vector<128x128xf32>
      tpu.vector_store %arg15[%c0_25, %c0_26], %44 {strides = array<i32>} : memref<128x128xf32, #tpu.memory_space<vmem>>, vector<128x128xf32>,
    } else {
    }
    %c0 = arith.constant 0 : index
    %c0_1 = arith.constant 0 : index
    %3 = vector.load %arg2[%c0, %c0_1] : memref<128x8xf32, #tpu.memory_space<vmem>>, vector<128x8xf32>
    %c0_2 = arith.constant 0 : index
    %c0_3 = arith.constant 0 : index
    %4 = vector.load %arg3[%c0_2, %c0_3] : memref<8x128xf32, #tpu.memory_space<vmem>>, vector<8x128xf32>
    %5 = arith.mulf %3, %3 : vector<128x8xf32>
    %cst = arith.constant dense<0.000000e+00> : vector<128xf32>
    %6 = vector.multi_reduction <add>, %5, %cst [1] : vector<128x8xf32> to vector<128xf32>
    %7 = vector.shape_cast %6 : vector<128xf32> to vector<128x1xf32>
    %8 = arith.mulf %4, %4 : vector<8x128xf32>
    %cst_4 = arith.constant dense<0.000000e+00> : vector<128xf32>
    %9 = vector.multi_reduction <add>, %8, %cst_4 [0] : vector<8x128xf32> to vector<128xf32>
    %10 = vector.shape_cast %9 : vector<128xf32> to vector<1x128xf32>
    %cst_5 = arith.constant dense<0.000000e+00> : vector<128x128xf32>
    %11 = tpu.matmul %3, %4, %cst_5 {dimension_numbers = #tpu.dot_dimension_numbers<[1], [0], [0], [1], [0, 0, 1, 1], [], []>} : vector<128x8xf32>, vector<8x128xf32>, vector<128x128xf32> -> vector<128x128xf32>
    %12 = vector.broadcast %7 : vector<128x1xf32> to vector<128x128xf32>
    %13 = vector.broadcast %10 : vector<1x128xf32> to vector<128x128xf32>
    %14 = arith.addf %12, %13 : vector<128x128xf32>
    %cst_6 = arith.constant 2.000000e+00 : f32
    %15 = vector.broadcast %cst_6 : f32 to vector<128x128xf32>
    %16 = arith.mulf %15, %11 : vector<128x128xf32>
    %17 = arith.subf %14, %16 : vector<128x128xf32>
    %cst_7 = arith.constant 0.000000e+00 : f32
    %18 = vector.broadcast %cst_7 : f32 to vector<128x128xf32>
    %19 = arith.maximumf %17, %18 : vector<128x128xf32>
    %c0_8 = arith.constant 0 : index
    %c0_9 = arith.constant 0 : index
    %20 = vector.load %arg4[%c0_8, %c0_9] : memref<128x1xi32, #tpu.memory_space<vmem>>, vector<128x1xi32>
    %c0_10 = arith.constant 0 : index
    %c0_11 = arith.constant 0 : index
    %21 = vector.load %arg5[%c0_10, %c0_11] : memref<1x128xi32, #tpu.memory_space<vmem>>, vector<1x128xi32>
    %22 = vector.broadcast %20 : vector<128x1xi32> to vector<128x128xi32>
    %23 = vector.broadcast %21 : vector<1x128xi32> to vector<128x128xi32>
    %24 = arith.cmpi eq, %22, %23 : vector<128x128xi32>
    %cst_12 = arith.constant 6.250000e+00 : f32
    %25 = vector.broadcast %cst_12 : f32 to vector<128x128xf32>
    %26 = arith.cmpf ole, %19, %25 : vector<128x128xf32>
    %27 = arith.andi %24, %26 : vector<128x128xi1>
    %cst_13 = arith.constant 0.000000e+00 : f32
    %28 = vector.broadcast %cst_13 : f32 to vector<128x128xf32>
    %29 = arith.subf %28, %19 : vector<128x128xf32>
    %cst_14 = arith.constant 5.000000e-01 : f32
    %30 = vector.broadcast %cst_14 : f32 to vector<128x128xf32>
    %31 = arith.mulf %29, %30 : vector<128x128xf32>
    %32 = math.exp %31 : vector<128x128xf32>
    %cst_15 = arith.constant 0.000000e+00 : f32
    %33 = vector.broadcast %cst_15 : f32 to vector<128x128xf32>
    %34 = arith.select %27, %32, %33 : vector<128x128xi1>, vector<128x128xf32>
    %c0_16 = arith.constant 0 : index
    %c0_17 = arith.constant 0 : index
    %35 = vector.load %arg15[%c0_16, %c0_17] : memref<128x128xf32, #tpu.memory_space<vmem>>, vector<128x128xf32>
    %36 = arith.truncf %34 : vector<128x128xf32> to vector<128x128xbf16>
    %c0_18 = arith.constant 0 : index
    %c0_19 = arith.constant 0 : index
    %37 = vector.load %arg7[%c0_18, %c0_19] : memref<128x128xbf16, #tpu.memory_space<vmem>>, vector<128x128xbf16>
    %cst_20 = arith.constant dense<0.000000e+00> : vector<128x128xf32>
    %38 = tpu.matmul %36, %37, %cst_20 {dimension_numbers = #tpu.dot_dimension_numbers<[1], [0], [0], [1], [0, 0, 1, 1], [], []>} : vector<128x128xbf16>, vector<128x128xbf16>, vector<128x128xf32> -> vector<128x128xf32>
    %39 = arith.addf %35, %38 : vector<128x128xf32>
    %c0_21 = arith.constant 0 : index
    %c0_22 = arith.constant 0 : index
    %40 = vector.load %arg15[%c0_21, %c0_22] : memref<128x128xf32, #tpu.memory_space<vmem>>, vector<128x128xf32>
    tpu.vector_store %arg15[%c0_21, %c0_22], %39 {strides = array<i32>} : memref<128x128xf32, #tpu.memory_space<vmem>>, vector<128x128xf32>,
    %c1_i32 = arith.constant 1 : i32
    %41 = arith.cmpi eq, %arg1, %c1_i32 : i32
    %42 = arith.extui %41 : i1 to i32
    %c0_i32_23 = arith.constant 0 : i32
    %43 = arith.cmpi ne, %42, %c0_i32_23 : i32
    scf.if %43 {
      %c0_24 = arith.constant 0 : index
      %c0_25 = arith.constant 0 : index
      %44 = vector.load %arg15[%c0_24, %c0_25] : memref<128x128xf32, #tpu.memory_space<vmem>>, vector<128x128xf32>
      %45 = arith.truncf %44 : vector<128x128xf32> to vector<128x128xbf16>
      %c0_26 = arith.constant 0 : index
      %c0_27 = arith.constant 0 : index
      %46 = vector.load %arg8[%c0_26, %c0_27] : memref<128x128xbf16, #tpu.memory_space<vmem>>, vector<128x128xbf16>
      %cst_28 = arith.constant dense<0.000000e+00> : vector<128x128xf32>
      %47 = tpu.matmul %45, %46, %cst_28 {dimension_numbers = #tpu.dot_dimension_numbers<[1], [0], [0], [1], [0, 0, 1, 1], [], []>} : vector<128x128xbf16>, vector<128x128xbf16>, vector<128x128xf32> -> vector<128x128xf32>
      %c0_29 = arith.constant 0 : index
      %c0_30 = arith.constant 0 : index
      %48 = vector.load %arg10[%c0_29, %c0_30] : memref<1x128xf32, #tpu.memory_space<vmem>>, vector<1x128xf32>
      %49 = vector.broadcast %48 : vector<1x128xf32> to vector<128x128xf32>
      %50 = arith.addf %47, %49 : vector<128x128xf32>
      %c0_31 = arith.constant 0 : index
      %c0_32 = arith.constant 0 : index
      %51 = vector.load %arg9[%c0_31, %c0_32] : memref<128x128xbf16, #tpu.memory_space<vmem>>, vector<128x128xbf16>
      %cst_33 = arith.constant dense<0.000000e+00> : vector<128x128xf32>
      %52 = tpu.matmul %45, %51, %cst_33 {dimension_numbers = #tpu.dot_dimension_numbers<[1], [0], [0], [1], [0, 0, 1, 1], [], []>} : vector<128x128xbf16>, vector<128x128xbf16>, vector<128x128xf32> -> vector<128x128xf32>
      %c0_34 = arith.constant 0 : index
      %c0_35 = arith.constant 0 : index
      %53 = vector.load %arg11[%c0_34, %c0_35] : memref<1x128xf32, #tpu.memory_space<vmem>>, vector<1x128xf32>
      %54 = vector.broadcast %53 : vector<1x128xf32> to vector<128x128xf32>
      %55 = arith.addf %52, %54 : vector<128x128xf32>
      %56 = arith.negf %55 : vector<128x128xf32>
      %57 = math.exp %56 : vector<128x128xf32>
      %cst_36 = arith.constant 1.000000e+00 : f32
      %58 = vector.broadcast %cst_36 : f32 to vector<128x128xf32>
      %59 = arith.addf %58, %57 : vector<128x128xf32>
      %60 = arith.divf %58, %59 : vector<128x128xf32>
      %61 = arith.mulf %50, %60 : vector<128x128xf32>
      %62 = arith.truncf %61 : vector<128x128xf32> to vector<128x128xbf16>
      %c0_37 = arith.constant 0 : index
      %c0_38 = arith.constant 0 : index
      %63 = vector.load %arg12[%c0_37, %c0_38] : memref<128x128xbf16, #tpu.memory_space<vmem>>, vector<128x128xbf16>
      %cst_39 = arith.constant dense<0.000000e+00> : vector<128x128xf32>
      %64 = tpu.matmul %62, %63, %cst_39 {dimension_numbers = #tpu.dot_dimension_numbers<[1], [0], [0], [1], [0, 0, 1, 1], [], []>} : vector<128x128xbf16>, vector<128x128xbf16>, vector<128x128xf32> -> vector<128x128xf32>
      %c0_40 = arith.constant 0 : index
      %c0_41 = arith.constant 0 : index
      %65 = vector.load %arg13[%c0_40, %c0_41] : memref<1x128xf32, #tpu.memory_space<vmem>>, vector<1x128xf32>
      %66 = vector.broadcast %65 : vector<1x128xf32> to vector<128x128xf32>
      %67 = arith.addf %64, %66 : vector<128x128xf32>
      %68 = tpu.iota {dimensions = array<i32: 0>} : vector<8x128xi32>
      %c0_42 = arith.constant 0 : index
      %c0_43 = arith.constant 0 : index
      %69 = vector.load %arg6[%c0_42, %c0_43] : memref<1x128xi32, #tpu.memory_space<vmem>>, vector<1x128xi32>
      %70 = vector.broadcast %69 : vector<1x128xi32> to vector<8x128xi32>
      %71 = arith.cmpi eq, %68, %70 : vector<8x128xi32>
      %72 = arith.extui %71 : vector<8x128xi1> to vector<8x128xi32>
      %73 = arith.sitofp %72 : vector<8x128xi32> to vector<8x128xf32>
      %cst_44 = arith.constant dense<0.000000e+00> : vector<8x128xf32>
      %74 = tpu.matmul %73, %67, %cst_44 {dimension_numbers = #tpu.dot_dimension_numbers<[1], [0], [0], [1], [0, 0, 1, 1], [], []>} : vector<8x128xf32>, vector<128x128xf32>, vector<8x128xf32> -> vector<8x128xf32>
      %75 = vector.shape_cast %74 : vector<8x128xf32> to vector<1x8x128xf32>
      %c0_45 = arith.constant 0 : index
      %c0_46 = arith.constant 0 : index
      %c0_47 = arith.constant 0 : index
      %76 = vector.load %arg14[%c0_45, %c0_46, %c0_47] : memref<1x8x128xf32, #tpu.memory_space<vmem>>, vector<1x8x128xf32>
      tpu.vector_store %arg14[%c0_45, %c0_46, %c0_47], %75 {strides = array<i32>} : memref<1x8x128xf32, #tpu.memory_space<vmem>>, vector<1x8x128xf32>,
    } else {
    }
    return
  }
  func.func @transform_0(%arg0: i32, %arg1: i32) -> (i32, i32) {
    %c0_i32 = arith.constant 0 : i32
    %c0_i32_0 = arith.constant 0 : i32
    return %arg0, %c0_i32 : i32, i32
  }
  func.func @transform_1(%arg0: i32, %arg1: i32) -> (i32, i32) {
    %c0_i32 = arith.constant 0 : i32
    %c0_i32_0 = arith.constant 0 : i32
    return %c0_i32, %arg1 : i32, i32
  }
  func.func @transform_2(%arg0: i32, %arg1: i32) -> (i32, i32) {
    %c0_i32 = arith.constant 0 : i32
    %c0_i32_0 = arith.constant 0 : i32
    return %arg0, %c0_i32 : i32, i32
  }
  func.func @transform_3(%arg0: i32, %arg1: i32) -> (i32, i32) {
    %c0_i32 = arith.constant 0 : i32
    %c0_i32_0 = arith.constant 0 : i32
    return %c0_i32, %arg1 : i32, i32
  }
  func.func @transform_4(%arg0: i32, %arg1: i32) -> (i32, i32) {
    %c0_i32 = arith.constant 0 : i32
    %c0_i32_0 = arith.constant 0 : i32
    return %c0_i32, %arg0 : i32, i32
  }
  func.func @transform_5(%arg0: i32, %arg1: i32) -> (i32, i32) {
    %c0_i32 = arith.constant 0 : i32
    %c0_i32_0 = arith.constant 0 : i32
    return %arg1, %c0_i32 : i32, i32
  }
  func.func @transform_6(%arg0: i32, %arg1: i32) -> (i32, i32) {
    %c0_i32 = arith.constant 0 : i32
    %c0_i32_0 = arith.constant 0 : i32
    %c0_i32_1 = arith.constant 0 : i32
    return %c0_i32, %c0_i32_0 : i32, i32
  }
  func.func @transform_7(%arg0: i32, %arg1: i32) -> (i32, i32) {
    %c0_i32 = arith.constant 0 : i32
    %c0_i32_0 = arith.constant 0 : i32
    %c0_i32_1 = arith.constant 0 : i32
    return %c0_i32, %c0_i32_0 : i32, i32
  }
  func.func @transform_8(%arg0: i32, %arg1: i32) -> (i32, i32) {
    %c0_i32 = arith.constant 0 : i32
    %c0_i32_0 = arith.constant 0 : i32
    %c0_i32_1 = arith.constant 0 : i32
    return %c0_i32, %c0_i32_0 : i32, i32
  }
  func.func @transform_9(%arg0: i32, %arg1: i32) -> (i32, i32) {
    %c0_i32 = arith.constant 0 : i32
    %c0_i32_0 = arith.constant 0 : i32
    %c0_i32_1 = arith.constant 0 : i32
    return %c0_i32, %c0_i32_0 : i32, i32
  }
  func.func @transform_10(%arg0: i32, %arg1: i32) -> (i32, i32) {
    %c0_i32 = arith.constant 0 : i32
    %c0_i32_0 = arith.constant 0 : i32
    %c0_i32_1 = arith.constant 0 : i32
    return %c0_i32, %c0_i32_0 : i32, i32
  }
  func.func @transform_11(%arg0: i32, %arg1: i32) -> (i32, i32) {
    %c0_i32 = arith.constant 0 : i32
    %c0_i32_0 = arith.constant 0 : i32
    %c0_i32_1 = arith.constant 0 : i32
    return %c0_i32, %c0_i32_0 : i32, i32
  }
  func.func @transform_12(%arg0: i32, %arg1: i32) -> (i32, i32, i32) {
    %c0_i32 = arith.constant 0 : i32
    %c0_i32_0 = arith.constant 0 : i32
    %c0_i32_1 = arith.constant 0 : i32
    return %arg0, %c0_i32, %c0_i32_0 : i32, i32, i32
  }
}

</mosaic_0001>

<bundles_post_ra>
// kernel: tpu_custom_call.1
= control target key start
LH: loop header
LB: loop body
LE: loop exit
PB: predicated region body
PF: predicated region fallthrough
CT: control target
= control target key end

     0   :  { %s3674_s0 = inlined_call_operand.vmem [shape: f32[256,8], index: 0, kind: input, shape index: {}]   ;;  %s3675_s1 = inlined_call_operand.vmem [shape: f32[8,256], index: 1, kind: input, shape index: {}]   ;;  %s3676_s2 = inlined_call_operand.vmem [shape: s32[256,1], index: 2, kind: input, shape index: {}]   ;;  %s3677_s3 = inlined_call_operand.vmem [shape: s32[1,256], index: 3, kind: input, shape index: {}]   ;;  %s3678_s4 = inlined_call_operand.vmem [shape: s32[1,256], index: 4, kind: input, shape index: {}]   ;;  %s3679_s5 = inlined_call_operand.vmem [shape: bf16[256,128], index: 5, kind: input, shape index: {}]   ;;  %s3680_s6 = inlined_call_operand.vmem [shape: bf16[128,128], index: 6, kind: input, shape index: {}]   ;;  %s3681_s7 = inlined_call_operand.vmem [shape: bf16[128,128], index: 7, kind: input, shape index: {}]   ;;  %s3682_s8 = inlined_call_operand.vmem [shape: f32[1,128], index: 8, kind: input, shape index: {}]   ;;  %s3683_s9 = inlined_call_operand.vmem [shape: f32[1,128], index: 9, kind: input, shape index: {}]   ;;  %s3684_s10 = inlined_call_operand.vmem [shape: bf16[128,128], index: 10, kind: input, shape index: {}]   ;;  %s3685_s11 = inlined_call_operand.vmem [shape: f32[1,128], index: 11, kind: input, shape index: {}]   ;;  %s3686_s12 = inlined_call_operand.hbm [shape: f32[2,8,128], index: 12, kind: output, shape index: {}]  }
   0x1   :  { %3702 = sst [smem:[#allocation17_spill]] %s3674_s0 }
   0x2   :  { %3703 = sst [smem:[#allocation18_spill]] %s3685_s11 }
   0x3   :  { %3704 = sst [smem:[#allocation19_spill]] %s3686_s12 }
   0x4   :  { %17 = vsyncpa [#allocation4], 0 }
   0x5   :  { %19 = vsyncpa [#allocation4 + $0x1], 0  ;;  %s2983_s21 = smov 0   ;;  %s2985_s22 = smov 0  }
   0x6   :  { %s2987_s23 = smov 0   ;;  %s2989_s24 = smov 0  }
   0x7   :  { %s2991_s25 = smov 0   ;;  %s2993_s26 = smov 0  }
   0x8   :  { %s2995_s27 = smov 0   ;;  %s2997_s28 = smov 0  }
   0x9 LB: > { %3705 = sst [smem:[#allocation6_spill]] %s2881_s21  ;;  %s2167_s29 = sadd.s32 4294967295, %s2909_s28   ;;  %s2909_s28 = sphi %s2997_s28, %s25_s28   ;;  %s2905_s27 = sphi %s2995_s27, %s3778_s27   ;;  %s2901_s26 = sphi %s2993_s26, %s3777_s26   ;;  %s2897_s25 = sphi %s2991_s25, %s3776_s25   ;;  %s2893_s24 = sphi %s2989_s24, %s3775_s24   ;;  %s2889_s23 = sphi %s2987_s23, %s3774_s23   ;;  %s2885_s22 = sphi %s2985_s22, %s3773_s22   ;;  %s2881_s21 = sphi %s2983_s21, %s3772_s21  }
   0xa   : > { %3706 = sst [smem:[#allocation7_spill]] %s2885_s22  ;;  %s2168_s30 = sadd.s32 4294967294, %s2909_s28  }
   0xb   : > { %3707 = sst [smem:[#allocation8_spill]] %s2889_s23  ;;  %s34_s13 = sadd.s32 1, %s2901_s26 }
   0xc   : > { %3708 = sst [smem:[#allocation9_spill]] %s2901_s26  ;;  %p35_p0 = scmp.ge.s32.totalorder %s34_s13, 2 }
   0xd   : > { %3709 = sst [smem:[#allocation10_spill]] %s2905_s27  ;;  %s37_s14 = sadd.s32 1, %s2905_s27 }
   0xe   : > { %3710 = sst [smem:[#allocation11_spill]] %s2909_s28  ;;  %p336_p1 = scmp.ne.s32.totalorder %s2889_s23, %s2885_s22 }
   0xf   : > { %p337_p2 = scmp.eq.s32.totalorder %s2167_s29, 3  ;;  %s3780_s13 = smov (%p35_p0, %s34_s13), 0 }
  0x10   : > { %3711 = sst [smem:[#allocation12_spill]] %s3780_s13  ;;  %s3782_s14 = smov (!%p35_p0, %s37_s14), %s2905_s27 }
  0x11   : > { %p3032_p3 = por %p337_p2, %p336_p1  ;;  %p342_p4 = scmp.ne.s32.totalorder %s2885_s22, %s2881_s21 }
  0x12   : > { %p39_p5 = scmp.ge.s32.totalorder %s3782_s14, 2  ;;  %p343_p6 = scmp.eq.s32.totalorder %s2168_s30, 3 }
  0x13   : > { %s3712_s15 = scalar_select %p3032_p3, 1, 0 }
  0x14   : > { %p2171_p7 = scmp.ge.s32.totalorder %s2909_s28, 1  ;;  %p425_p8 = scmp.lt.s32.totalorder %s2909_s28, 5 }
  0x15   : > { %3713 = sst [smem:[#allocation13_spill]] %s3712_s15  ;;  %s3784_s14 = smov (%p39_p5, %s3782_s14), 0 }
  0x16   : > { %3714 = sst [smem:[#allocation14_spill]] %s3784_s14  ;;  %p3042_p9 = por %p343_p6, %p342_p4 }
  0x17   : > { %p426_p10 = pnand %p2171_p7, %p425_p8  ;;  %s323_s17 = ssub.s32 %s2905_s27, %s3784_s14 }
  0x18   : > { %s3715_s16 = scalar_select %p3042_p9, 1, 0 }
  0x19   : > { %s326_s18 = sadd.s32 1, %s2889_s23  ;;  %p324_p11 = scmp.eq.s32.totalorder %s323_s17, 0 }
  0x1a   : > { %3716 = sst [smem:[#allocation15_spill]] %s3715_s16  ;;  %429 = sbr.rel (%p426_p10) target bundleno = 1267 (0x4f3), region = 68 }
  0x1b   : > { %s3050_s19 = scalar_select %p324_p11, %s2889_s23, %s326_s18  }
  0x1c   : > { %s3691_s20 = sand.u32 (!%p426_p10), 1, %s2885_s22   ;;  %s2173_s29 = sshll.u32 (!%p426_p10), %s2897_s25, 4 }
  0x1d   : > { %3717 = sst [smem:[#allocation16_spill]] %s3050_s19  ;;  %s3056_s30 = sshll.u32 (!%p426_p10), %s3691_s20, 3 }
  0x1e   : > { %p488_p12 = scmp.lt.s32.totalorder (!%p426_p10), %s2173_s29, 31  ;;  %p493_p13 = scmp.lt.s32.totalorder (!%p426_p10), %s2893_s24, 1 }
  0x1f   : > { %p506_p0 = scmp.lt.s32.totalorder (!%p426_p10), %s2897_s25, 1  ;;  %s3718_s0 = sld [smem:[#allocation17_spill]] (!%p426_p10) }
  0x20   : > { %s2178_s22 = sshll.u32 (!%p426_p10), %s2893_s24, 4  ;;  %s486_s16 = scalar_lea.vmem (!%p426_p10), [#allocation3], %s3056_s30 }
  0x21   : > { %s3786_s29 = smov (!%p488_p12, %s2173_s29), 31  ;;  %p510_p1 = scmp.lt.s32.totalorder %s2178_s22, 31 }
  0x22   : > { %s3060_s17 = scalar_select %p493_p13, %s2893_s24, 1 }
  0x23   : > { %s2174_s18 = sshll.u32 %s3786_s29, 3  ;;  %s3788_s22 = smov (!%p510_p1, %s2178_s22), 31 }
  0x24   : > { %s2175_s26 = sshll.u32 %s3060_s17, 3  ;;  %s3077_s28 = scalar_lea.vmem %s3676_s2, %s2174_s18 }
  0x25   : > { %s3066_s27 = scalar_lea.vmem %s3718_s0, %s2174_s18  ;;  %s3072_s20 = scalar_lea.vmem %s3675_s1, %s2175_s26 }
  0x26   : > { %s505_s29 = scalar_lea.vmem %s3677_s3, %s3060_s17  ;;  %s2179_s26 = sshll.u32 %s3788_s22, 2 }
  0x27   : > { %s3085_s11 = scalar_select %p506_p0, %s2897_s25, 1 }
  0x28   : > { %s3094_s21 = scalar_lea.vmem %s3679_s5, %s2179_s26  ;;  %p2180_p2 = scmp.ne.s32.totalorder %s2893_s24, 0 }
  0x29   : > { %s508_s23 = scalar_lea.vmem %s3678_s4, %s3085_s11  ;;  %v2911_v0 = vmov (!%p2180_p2), 0.0  }
  0x2a   : > { %519 = sbr.rel (%p2180_p2) target bundleno = 50 (0x32), region = 72  ;;  %520 = vst [vmem:[#allocation2] sm:$0xff] (!%p2180_p2), %v2911_v0  ;;  %521 = vst [vmem:[#allocation2 + $0x8] sm:$0xff] (!%p2180_p2), %v2911_v0 }
  0x2b   : > { %522 = vst [vmem:[#allocation2 + $0x10] sm:$0xff] (!%p2180_p2), %v2911_v0  ;;  %523 = vst [vmem:[#allocation2 + $0x18] sm:$0xff] (!%p2180_p2), %v2911_v0 }
  0x2c   : > { %524 = vst [vmem:[#allocation2 + $0x20] sm:$0xff] (!%p2180_p2), %v2911_v0  ;;  %525 = vst [vmem:[#allocation2 + $0x28] sm:$0xff] (!%p2180_p2), %v2911_v0 }
  0x2d   : > { %526 = vst [vmem:[#allocation2 + $0x30] sm:$0xff] (!%p2180_p2), %v2911_v0  ;;  %527 = vst [vmem:[#allocation2 + $0x38] sm:$0xff] (!%p2180_p2), %v2911_v0 }
  0x2e   : > { %528 = vst [vmem:[#allocation2 + $0x40] sm:$0xff] (!%p2180_p2), %v2911_v0  ;;  %529 = vst [vmem:[#allocation2 + $0x48] sm:$0xff] (!%p2180_p2), %v2911_v0 }
  0x2f   : > { %530 = vst [vmem:[#allocation2 + $0x50] sm:$0xff] (!%p2180_p2), %v2911_v0  ;;  %531 = vst [vmem:[#allocation2 + $0x58] sm:$0xff] (!%p2180_p2), %v2911_v0 }
  0x30   : > { %532 = vst [vmem:[#allocation2 + $0x60] sm:$0xff] (!%p2180_p2), %v2911_v0  ;;  %533 = vst [vmem:[#allocation2 + $0x68] sm:$0xff] (!%p2180_p2), %v2911_v0 }
  0x31   : > { %534 = vst [vmem:[#allocation2 + $0x70] sm:$0xff] %v2911_v0  ;;  %535 = vst [vmem:[#allocation2 + $0x78] sm:$0xff] %v2911_v0 }
  0x32 PF: > { %v3099_v1 = vld [vmem:[%s3072_s20] sm:$0xff]  ;;  %vm569_vm0 = vcmask 64512   ;;  %v537_v3 = vld [vmem:[%s3066_s27 + $0x8] sm:$0xff]  ;;  %v538_v4 = vld [vmem:[%s3066_s27 + $0x10] sm:$0xff]  ;;  %v2912_v9 = vmov 0   ;;  %p2230_p4 = scmp.ne.s32.totalorder %s2893_s24, 1 }
  0x33   : > { %v536_v2 = vld [vmem:[%s3066_s27] sm:$0xff]  ;;  %2379 = vmatprep.subr.mxu0 %v3099_v1  ;;  %v542_v6 = vld [vmem:[%s3066_s27 + $0x30] sm:$0xff]  ;;  %v543_v7 = vld [vmem:[%s3066_s27 + $0x38] sm:$0xff]  ;;  %2686 = vset.pattern.permute.xlu1 %v2912_v9  ;;  %v554_v32 = vmul.f32 %v537_v3, %v537_v3  ;;  %v555_v40 = vmul.f32 %v538_v4, %v538_v4  ;;  %s3764_s18 = sld [smem:[#allocation18_spill]] (!%p2230_p4) }
  0x34   : > { %2381 = vmatprep.mubr.msk.f32.mxu0 %vm569_vm0, %v536_v2  ;;  %v540_v5 = vld [vmem:[%s3066_s27 + $0x20] sm:$0xff]  ;;  %2380 = vmatpush3.msra.mxu0 %v3099_v1  ;;  %v541_v10 = vld [vmem:[%s3066_s27 + $0x28] sm:$0xff]  ;;  %v559_v11 = vmul.f32 %v542_v6, %v542_v6  ;;  %v560_v12 = vmul.f32 %v543_v7, %v543_v7  ;;  %v539_v13 = vld [vmem:[%s3066_s27 + $0x18] sm:$0xff]  ;;  %v553_v31 = vmul.f32 %v536_v2, %v536_v2 }
  0x35   : > { %v557_v8 = vmul.f32 %v540_v5, %v540_v5  ;;  %2382 = vmatmul.mubr.msk.f32.vlgmr.msra.gmra.mrb[0].mxu0 %vm569_vm0, %v537_v3  ;;  %2685 = vset.pattern.permute.xlu0 %v2912_v9  ;;  %v545_v14 = vld [vmem:[%s3066_s27 + $0x48] sm:$0xff]  ;;  %v558_v16 = vmul.f32 %v541_v10, %v541_v10  ;;  %v547_v18 = vld [vmem:[%s3066_s27 + $0x58] sm:$0xff]  ;;  %v544_v19 = vld [vmem:[%s3066_s27 + $0x40] sm:$0xff]  ;;  %v573_v37 = vsel %vm569_vm0, %v554_v32, 0.0  ;;  %v556_v42 = vmul.f32 %v539_v13, %v539_v13 }
  0x36   : > { %2384 = vmatprep.mubr.msk.f32.mxu0 %vm569_vm0, %v538_v4  ;;  %v588_v17 = vsel %vm569_vm0, %v559_v11, 0.0  ;;  %v591_v21 = vsel %vm569_vm0, %v560_v12, 0.0  ;;  %v562_v22 = vmul.f32 %v545_v14, %v545_v14  ;;  %v546_v23 = vld [vmem:[%s3066_s27 + $0x50] sm:$0xff]  ;;  %v561_v24 = vmul.f32 %v544_v19, %v544_v19  ;;  %v548_v33 = vld [vmem:[%s3066_s27 + $0x60] sm:$0xff]  ;;  %v549_v34 = vld [vmem:[%s3066_s27 + $0x68] sm:$0xff] }
  0x37   : > { %v582_v15 = vsel %vm569_vm0, %v557_v8, 0.0  ;;  %589 = vadd.xlane.f32.xlu1 %v588_v17  ;;  %v585_v20 = vsel %vm569_vm0, %v558_v16, 0.0  ;;  %v564_v25 = vmul.f32 %v547_v18, %v547_v18  ;;  %v563_v26 = vmul.f32 %v546_v23, %v546_v23  ;;  %v550_v43 = vld [vmem:[%s3066_s27 + $0x70] sm:$0xff]  ;;  %v551_v44 = vld [vmem:[%s3066_s27 + $0x78] sm:$0xff]  ;;  %v887_v51 = vld [vmem:[%s3077_s28 + $0x28] sm:$0xff] }
  0x38   : > { %583 = vadd.xlane.f32.xlu0 %v582_v15  ;;  %v594_v27 = vsel %vm569_vm0, %v561_v24, 0.0  ;;  %v597_v28 = vsel %vm569_vm0, %v562_v22, 0.0  ;;  %v570_v35 = vsel %vm569_vm0, %v553_v31, 0.0  ;;  %v565_v36 = vmul.f32 %v548_v33, %v548_v33  ;;  %v888_v52 = vld [vmem:[%s3077_s28 + $0x30] sm:$0xff]  ;;  %v886_v53 = vld [vmem:[%s3077_s28 + $0x20] sm:$0xff]  ;;  %v889_v54 = vld [vmem:[%s3077_s28 + $0x38] sm:$0xff] }
  0x39   : > { %2385 = vmatmul.mubr.msk.f32.gmra.mrb[2].mxu0 %vm569_vm0, %v539_v13  ;;  %v603_v29 = vsel %vm569_vm0, %v564_v25, 0.0  ;;  %v600_v30 = vsel %vm569_vm0, %v563_v26, 0.0  ;;  %v566_v38 = vmul.f32 %v549_v34, %v549_v34  ;;  %v576_v45 = vsel %vm569_vm0, %v555_v40, 0.0  ;;  %v883_v55 = vld [vmem:[%s3077_s28 + $0x8] sm:$0xff]  ;;  %v890_v56 = vld [vmem:[%s3077_s28 + $0x40] sm:$0xff]  ;;  %v885_v59 = vld [vmem:[%s3077_s28 + $0x18] sm:$0xff] }
  0x3a   : > { %2387 = vmatprep.mubr.msk.f32.mxu0 %vm569_vm0, %v540_v5  ;;  %v606_v39 = vsel %vm569_vm0, %v565_v36, 0.0  ;;  %v567_v46 = vmul.f32 %v550_v43, %v550_v43  ;;  %v579_v47 = vsel %vm569_vm0, %v556_v42, 0.0  ;;  %v568_v48 = vmul.f32 %v551_v44, %v551_v44  ;;  %v895_v57 = vld [vmem:[%s3077_s28 + $0x68] sm:$0xff]  ;;  %v892_v60 = vld [vmem:[%s3077_s28 + $0x50] sm:$0xff]  ;;  %v897_v61 = vld [vmem:[%s3077_s28 + $0x78] sm:$0xff] }
  0x3b   : > { %592 = vadd.xlane.f32.xlu1 %v591_v21  ;;  %v609_v41 = vsel %vm569_vm0, %v566_v38, 0.0  ;;  %v891_v58 = vld [vmem:[%s3077_s28 + $0x48] sm:$0xff]  ;;  %v893_v62 = vld [vmem:[%s3077_s28 + $0x58] sm:$0xff]  ;;  %v882_v63 = vld [vmem:[%s3077_s28] sm:$0xff] }
  0x3c   : > { %586 = vadd.xlane.f32.xlu0 %v585_v20  ;;  %v612_v49 = vsel %vm569_vm0, %v567_v46, 0.0  ;;  %v615_v50 = vsel %vm569_vm0, %v568_v48, 0.0  ;;  %v2687_v0 = vld [vmem:[%s3094_s21] sm:$0xff]   ;;  %v884_v3 = vld [vmem:[%s3077_s28 + $0x10] sm:$0xff]  ;;  %v2688_v4 = vld [vmem:[%s3094_s21 + $0x8] sm:$0xff]  }
  0x3d   : > { %2388 = vmatmul.mubr.msk.f32.gmra.mrb[4].mxu0 %vm569_vm0, %v541_v10  ;;  %2405 = vmatprep.subr.bf16.mxu0 %v2687_v0  ;;  %v894_v2 = vld [vmem:[%s3077_s28 + $0x60] sm:$0xff]  ;;  %v896_v5 = vld [vmem:[%s3077_s28 + $0x70] sm:$0xff]  ;;  %v2692_v9 = vld [vmem:[%s3094_s21 + $0x28] sm:$0xff]  }
  0x3e   : > { %2390 = vmatprep.mubr.msk.f32.mxu0 %vm569_vm0, %v542_v6  ;;  %2592 = vmatprep.subr.bf16.mxu1 %v2687_v0  ;;  %v2689_v6 = vld [vmem:[%s3094_s21 + $0x10] sm:$0xff]   ;;  %v2691_v8 = vld [vmem:[%s3094_s21 + $0x20] sm:$0xff]   ;;  %v2694_v11 = vld [vmem:[%s3094_s21 + $0x38] sm:$0xff]  }
  0x3f   : > { %598 = vadd.xlane.f32.xlu1 %v597_v28  ;;  %2406 = vmatpush3.bf16.msra.mxu0 %v2687_v0  ;;  %v2693_v10 = vld [vmem:[%s3094_s21 + $0x30] sm:$0xff]   ;;  %v618_v28 = vmul.f32 %v3099_v1, %v3099_v1 }
  0x40   : > { %595 = vadd.xlane.f32.xlu0 %v594_v27  ;;  %2600 = vmatpush3.bf16.msra.mxu1 %v2687_v0 }
  0x41   : > { %2391 = vmatmul.mubr.msk.f32.gmra.mrb[6].mxu0 %vm569_vm0, %v543_v7  ;;  %2407 = vmatprep.subr.bf16.mxu0 %v2688_v4  ;;  %v2690_v7 = vld [vmem:[%s3094_s21 + $0x18] sm:$0xff]   ;;  %v619_v31 = vrot.slane %v618_v28, 4 }
  0x42   : > { %2393 = vmatprep.mubr.msk.f32.mxu0 %vm569_vm0, %v544_v19  ;;  %2593 = vmatprep.subr.bf16.mxu1 %v2688_v4 }
  0x43   : > { %604 = vadd.xlane.f32.xlu1 %v603_v29  ;;  %2408 = vmatpush3.bf16.msra.mxu0 %v2688_v4 }
  0x44   : > { %601 = vadd.xlane.f32.xlu0 %v600_v30  ;;  %2601 = vmatpush3.bf16.msra.mxu1 %v2688_v4 }
  0x45   : > { %2394 = vmatmul.mubr.msk.f32.gmra.mrb[8].mxu0 %vm569_vm0, %v545_v14  ;;  %2409 = vmatprep.subr.bf16.mxu0 %v2689_v6 }
  0x46   : > { %2396 = vmatprep.mubr.msk.f32.mxu0 %vm569_vm0, %v546_v23  ;;  %2594 = vmatprep.subr.bf16.mxu1 %v2689_v6 }
  0x47   : > { %574 = vadd.xlane.f32.xlu1 %v573_v37  ;;  %2410 = vmatpush3.bf16.msra.mxu0 %v2689_v6 }
  0x48   : > { %571 = vadd.xlane.f32.xlu0 %v570_v35  ;;  %2602 = vmatpush3.bf16.msra.mxu1 %v2689_v6 }
  0x49   : > { %2397 = vmatmul.mubr.msk.f32.gmra.mrb[10].mxu0 %vm569_vm0, %v547_v18  ;;  %2411 = vmatprep.subr.bf16.mxu0 %v2690_v7 }
  0x4a   : > { %2399 = vmatprep.mubr.msk.f32.mxu0 %vm569_vm0, %v548_v33  ;;  %2595 = vmatprep.subr.bf16.mxu1 %v2690_v7  ;;  %v620_v33 = vadd.f32 %v619_v31, %v618_v28 }
  0x4b   : > { %610 = vadd.xlane.f32.xlu1 %v609_v41  ;;  %2412 = vmatpush3.bf16.msra.mxu0 %v2690_v7 }
  0x4c   : > { %607 = vadd.xlane.f32.xlu0 %v606_v39  ;;  %2603 = vmatpush3.bf16.msra.mxu1 %v2690_v7  ;;  %v621_v36 = vrot.slane %v620_v33, 2 }
  0x4d   : > { %2400 = vmatmul.mubr.msk.f32.gmra.mrb[12].mxu0 %vm569_vm0, %v549_v34  ;;  %2413 = vmatprep.subr.bf16.mxu0 %v2691_v8 }
  0x4e   : > { %2402 = vmatprep.mubr.msk.f32.mxu0 %vm569_vm0, %v550_v43  ;;  %2596 = vmatprep.subr.bf16.mxu1 %v2691_v8  ;;  %v622_v39 = vadd.f32 %v621_v36, %v620_v33 }
  0x4f   : > { %580 = vadd.xlane.f32.xlu1 %v579_v47  ;;  %2414 = vmatpush3.bf16.msra.mxu0 %v2691_v8 }
  0x50   : > { %577 = vadd.xlane.f32.xlu0 %v576_v45  ;;  %2604 = vmatpush3.bf16.msra.mxu1 %v2691_v8  ;;  %v623_v1 = vrot.slane %v622_v39, 1 }
  0x51   : > { %2403 = vmatmul.mubr.msk.f32.gmra.mrb[14].mxu0 %vm569_vm0, %v551_v44  ;;  %2415 = vmatprep.subr.bf16.mxu0 %v2692_v9 }
  0x52   : > { %2597 = vmatprep.subr.bf16.mxu1 %v2692_v9  ;;  %v624_v42 = vadd.f32 %v623_v1, %v622_v39 }
  0x53   : > { %616 = vadd.xlane.f32.xlu1 %v615_v50  ;;  %2416 = vmatpush3.bf16.msra.mxu0 %v2692_v9 }
  0x54   : > { %613 = vadd.xlane.f32.xlu0 %v612_v49  ;;  %2605 = vmatpush3.bf16.msra.mxu1 %v2692_v9 }
  0x55   : > { %2417 = vmatprep.subr.bf16.mxu0 %v2693_v10  ;;  %2598 = vmatprep.subr.bf16.mxu1 %v2693_v10 }
  0x57   : > { %2418 = vmatpush3.bf16.msra.mxu0 %v2693_v10 }
  0x58   : > { %2606 = vmatpush3.bf16.msra.mxu1 %v2693_v10  ;;  %2419 = vmatprep.subr.bf16.mxu0 %v2694_v11 }
  0x59   : > { %2599 = vmatprep.subr.bf16.mxu1 %v2694_v11 }
  0x5b   : > { %2420 = vmatpush3.bf16.msra.mxu0 %v2694_v11 }
  0x5c   : > { %2607 = vmatpush3.bf16.msra.mxu1 %v2694_v11 }
  0x64   : > { %915 = vperm.xlu1 %2686, %v887_v51  }
  0x68   : > { %918 = vperm.xlu1 %2686, %v888_v52  }
  0x6a   : > { %912 = vperm.xlu0 %2685, %v886_v53  }
  0x6c   : > { %921 = vperm.xlu1 %2686, %v889_v54  }
  0x6e   : > { %903 = vperm.xlu0 %2685, %v883_v55   ;;  %v3210_v55 = vld [vmem:[%s505_s29] ss:$0 sm:$0xff] }
  0x70   : > { %924 = vperm.xlu1 %2686, %v890_v56  }
  0x72   : > { %939 = vperm.xlu0 %2685, %v895_v57  }
  0x74   : > { %927 = vperm.xlu1 %2686, %v891_v58  }
  0x76   : > { %909 = vperm.xlu0 %2685, %v885_v59  }
  0x78   : > { %930 = vperm.xlu1 %2686, %v892_v60  }
  0x7a   : > { %945 = vperm.xlu0 %2685, %v897_v61  }
  0x7c   : > { %933 = vperm.xlu1 %2686, %v893_v62  }
  0x80   : > { %900 = vperm.xlu1 %2686, %v882_v63  }
  0x84   : > { %936 = vperm.xlu1 %2686, %v894_v2  }
  0x88   : > { %906 = vperm.xlu1 %2686, %v884_v3  }
  0x8c   : > { %942 = vperm.xlu1 %2686, %v896_v5  }
  0xc4   : > { %v590_v12 = vpop.xlane.xlu1 %589 }
  0xc5   : > { %v584_v14 = vpop.xlane.xlu0 %583  ;;  %v3197_v48 = vadd.f32 %v624_v42, %v590_v12 }
  0xc6   : > { %v3193_v44 = vadd.f32 %v624_v42, %v584_v14 }
  0xc8   : > { %v593_v13 = vpop.xlane.xlu1 %592 }
  0xc9   : > { %v587_v17 = vpop.xlane.xlu0 %586  ;;  %v3201_v53 = vadd.f32 %v624_v42, %v593_v13 }
  0xca   : > { %v3199_v50 = vadd.f32 %v624_v42, %v587_v17 }
  0xcc   : > { %v599_v15 = vpop.xlane.xlu1 %598 }
  0xcd   : > { %v596_v19 = vpop.xlane.xlu0 %595  ;;  %v3203_v54 = vadd.f32 %v624_v42, %v599_v15 }
  0xce   : > { %v3212_v56 = vadd.f32 %v624_v42, %v596_v19 }
  0xd0   : > { %v605_v16 = vpop.xlane.xlu1 %604 }
  0xd1   : > { %v602_v22 = vpop.xlane.xlu0 %601  ;;  %v3214_v58 = vadd.f32 %v624_v42, %v605_v16 }
  0xd2   : > { %v3216_v60 = vadd.f32 %v624_v42, %v602_v22 }
  0xd4   : > { %v575_v18 = vpop.xlane.xlu1 %574 }
  0xd5   : > { %v572_v24 = vpop.xlane.xlu0 %571  ;;  %v819_v49 = vadd.f32 %v624_v42, %v575_v18 }
  0xd6   : > { %v818_v45 = vadd.f32 %v624_v42, %v572_v24 }
  0xd8   : > { %v611_v20 = vpop.xlane.xlu1 %610 }
  0xd9   : > { %v608_v27 = vpop.xlane.xlu0 %607  ;;  %v3220_v63 = vadd.f32 %v624_v42, %v611_v20 }
  0xda   : > { %v3222_v0 = vadd.f32 %v624_v42, %v608_v27 }
  0xdc   : > { %v581_v21 = vpop.xlane.xlu1 %580 }
  0xdd   : > { %v578_v30 = vpop.xlane.xlu0 %577  ;;  %v821_v59 = vadd.f32 %v624_v42, %v581_v21 }
  0xde   : > { %v820_v2 = vadd.f32 %v624_v42, %v578_v30 }
  0xe0   : > { %v617_v23 = vpop.xlane.xlu1 %616 }
  0xe1   : > { %v614_v35 = vpop.xlane.xlu0 %613  ;;  %v3227_v9 = vadd.f32 %v624_v42, %v617_v23 }
  0xe2   : > { %v3224_v5 = vadd.f32 %v624_v42, %v614_v35 }
  0xe4   : > { %v3175_v25 = vpop.permute.xlu1 %915 }
  0xe5   : > { %vm956_vm3 = vcmp.eq.s32.totalorder %v3175_v25, %v3210_v55 }
  0xe8   : > { %v3177_v26 = vpop.permute.xlu1 %918 }
  0xe9   : > { %v3189_v38 = vpop.permute.xlu0 %912  ;;  %vm957_vm14 = vcmp.eq.s32.totalorder %v3177_v26, %v3210_v55 }
  0xea   : > { %vm955_vm5 = vcmp.eq.s32.totalorder %v3189_v38, %v3210_v55 }
  0xec   : > { %v3181_v29 = vpop.permute.xlu1 %921 }
  0xed   : > { %v904_v41 = vpop.permute.xlu0 %903  ;;  %vm958_vm12 = vcmp.eq.s32.totalorder %v3181_v29, %v3210_v55 }
  0xee   : > { %vm952_vm1 = vcmp.eq.s32.totalorder %v904_v41, %v3210_v55 }
  0xf0   : > { %v3183_v32 = vpop.permute.xlu1 %924 }
  0xf1   : > { %v3195_v47 = vpop.permute.xlu0 %939 }
  0xf4   : > { %v3185_v34 = vpop.permute.xlu1 %927 }
  0xf5   : > { %v910_v12 = vpop.permute.xlu0 %909 }
  0xf6   : > { %vm954_vm9 = vcmp.eq.s32.totalorder %v910_v12, %v3210_v55 }
  0xf8   : > { %v3187_v37 = vpop.permute.xlu1 %930 }
  0xf9   : > { %v3325_v26 = vpop.permute.xlu0 %945 }
  0xfc   : > { %v3191_v40 = vpop.permute.xlu1 %933 }
 0x100   : > { %v901_v43 = vpop.permute.xlu1 %900 }
 0x101   : > { %vm951_vm2 = vcmp.eq.s32.totalorder %v901_v43, %v3210_v55 }
 0x104   : > { %v3218_v62 = vpop.permute.xlu1 %936 }
 0x108   : > { %v2383_v46 = vpop.f32.mrb[0].mxu0  ;;  %v907_v22 = vpop.permute.xlu1 %906 }
 0x109   : > { %v835_v51 = vmul.f32 2.0, %v2383_v46  ;;  %v739_v52 = vpop.f32.mrb[1].mxu0  ;;  %vm953_vm11 = vcmp.eq.s32.totalorder %v907_v22, %v3210_v55 }
 0x10a   : > { %v834_v57 = vmul.f32 2.0, %v739_v52 }
 0x10b   : > { %v851_v61 = vsub.f32 %v819_v49, %v835_v51 }
 0x10c   : > { %v850_v3 = vsub.f32 %v818_v45, %v834_v57  ;;  %v2386_v4 = vpop.f32.mrb[2].mxu0 }
 0x10d   : > { %v867_v6 = vmax.f32 %v851_v61, 0.0  ;;  %v837_v7 = vmul.f32 2.0, %v2386_v4  ;;  %v749_v8 = vpop.f32.mrb[3].mxu0 }
 0x10e   : > { %v866_v10 = vmax.f32 %v850_v3, 0.0  ;;  %v836_v11 = vmul.f32 2.0, %v749_v8 }
 0x10f   : > { %v1000_v13 = vsub.f32 0.0, %v867_v6  ;;  %vm968_vm4 = vcmp.le.f32.partialorder %v867_v6, 6.25  ;;  %v853_v14 = vsub.f32 %v821_v59, %v837_v7 }
 0x110   : > { %v999_v15 = vsub.f32 0.0, %v866_v10  ;;  %vm967_vm6 = vcmp.le.f32.partialorder %v866_v10, 6.25  ;;  %vm3236_vm7 = vmand %vm952_vm1, %vm968_vm4  ;;  %v852_v17 = vsub.f32 %v820_v2, %v836_v11  ;;  %v2389_v18 = vpop.f32.mrb[4].mxu0  ;;  %vm960_vm4 = vcmp.eq.s32.totalorder %v3185_v34, %v3210_v55 }
 0x111   : > { %v1016_v19 = vmul.f32 0.5, %v1000_v13  ;;  %vm3242_vm8 = vmand %vm951_vm2, %vm967_vm6  ;;  %v869_v21 = vmax.f32 %v853_v14, 0.0  ;;  %v839_v23 = vmul.f32 2.0, %v2389_v18  ;;  %v759_v24 = vpop.f32.mrb[5].mxu0 }
 0x112   : > { %v1015_v27 = vmul.f32 0.5, %v999_v15  ;;  %v868_v28 = vmax.f32 %v852_v17, 0.0  ;;  %v838_v30 = vmul.f32 2.0, %v759_v24 }
 0x113   : > { %v1033_v31 = vmul.f32 1.442695, %v1016_v19  ;;  %v1002_v33 = vsub.f32 0.0, %v869_v21  ;;  %v855_v35 = vsub.f32 %v3199_v50, %v839_v23  ;;  %vm970_vm13 = vcmp.le.f32.partialorder %v869_v21, 6.25 }
 0x114   : > { %v1031_v36 = vmul.f32 1.442695, %v1015_v27  ;;  %v1001_v39 = vsub.f32 0.0, %v868_v28  ;;  %vm969_vm15 = vcmp.le.f32.partialorder %v868_v28, 6.25  ;;  %v854_v1 = vsub.f32 %v3193_v44, %v838_v30  ;;  %vm3260_vm0 = vmand %vm954_vm9, %vm970_vm13  ;;  %v2392_v42 = vpop.f32.mrb[6].mxu0 }
 0x115   : > { %2695 = vpow2.f32 %v1033_v31  ;;  %v1018_v43 = vmul.f32 0.5, %v1002_v33  ;;  %vm3266_vm1 = vmand %vm953_vm11, %vm969_vm15  ;;  %v871_v46 = vmax.f32 %v855_v35, 0.0  ;;  %v841_v49 = vmul.f32 2.0, %v2392_v42  ;;  %v769_v50 = vpop.f32.mrb[7].mxu0 }
 0x116   : > { %2697 = vpow2.f32 %v1031_v36  ;;  %v1017_v44 = vmul.f32 0.5, %v1001_v39  ;;  %v870_v51 = vmax.f32 %v854_v1, 0.0  ;;  %v840_v52 = vmul.f32 2.0, %v769_v50 }
 0x117   : > { %v1037_v57 = vmul.f32 1.442695, %v1018_v43  ;;  %v1004_v59 = vsub.f32 0.0, %v871_v46  ;;  %v857_v61 = vsub.f32 %v3201_v53, %v841_v49  ;;  %vm972_vm6 = vcmp.le.f32.partialorder %v871_v46, 6.25 }
 0x118   : > { %vm959_vm9 = vcmp.eq.s32.totalorder %v3183_v32, %v3210_v55  ;;  %v1035_v2 = vmul.f32 1.442695, %v1017_v44  ;;  %v1003_v3 = vsub.f32 0.0, %v870_v51  ;;  %v856_v4 = vsub.f32 %v3197_v48, %v840_v52  ;;  %v2395_v6 = vpop.f32.mrb[8].mxu0  ;;  %vm3283_vm13 = vmand %vm956_vm3, %vm972_vm6 }
 0x119   : > { %vm971_vm11 = vcmp.le.f32.partialorder %v870_v51, 6.25  ;;  %2699 = vpow2.f32 %v1037_v57  ;;  %v1020_v8 = vmul.f32 0.5, %v1004_v59  ;;  %v873_v53 = vmax.f32 %v857_v61, 0.0  ;;  %v779_v11 = vpop.f32.mrb[9].mxu0 }
 0x11a   : > { %v843_v10 = vmul.f32 2.0, %v2395_v6  ;;  %vm3290_vm15 = vmand %vm955_vm5, %vm971_vm11  ;;  %2701 = vpow2.f32 %v1035_v2  ;;  %v1019_v48 = vmul.f32 0.5, %v1003_v3  ;;  %v872_v13 = vmax.f32 %v856_v4, 0.0 }
 0x11b   : > { %v842_v25 = vmul.f32 2.0, %v779_v11  ;;  %vm962_vm6 = vcmp.eq.s32.totalorder %v3191_v40, %v3210_v55  ;;  %v1041_v14 = vmul.f32 1.442695, %v1020_v8  ;;  %vm974_vm2 = vcmp.le.f32.partialorder %v873_v53, 6.25 }
 0x11c   : > { %v1006_v15 = vsub.f32 0.0, %v873_v53  ;;  %v859_v38 = vsub.f32 %v3203_v54, %v843_v10  ;;  %v1039_v17 = vmul.f32 1.442695, %v1019_v48  ;;  %vm973_vm11 = vcmp.le.f32.partialorder %v872_v13, 6.25  ;;  %v2398_v21 = vpop.f32.mrb[10].mxu0  ;;  %vm3307_vm3 = vmand %vm958_vm12, %vm974_vm2  ;;  %v1083_v10 = vld [vmem:[#allocation2 + $0x20] sm:$0xff] }
 0x11d   : > { %v1005_v18 = vsub.f32 0.0, %v872_v13  ;;  %v858_v19 = vsub.f32 %v3212_v56, %v842_v25  ;;  %2703 = vpow2.f32 %v1041_v14  ;;  %v845_v24 = vmul.f32 2.0, %v2398_v21  ;;  %v789_v27 = vpop.f32.mrb[11].mxu0  ;;  %vm3316_vm5 = vmand %vm957_vm14, %vm973_vm11 }
 0x11e   : > { %v1022_v54 = vmul.f32 0.5, %v1006_v15  ;;  %v875_v23 = vmax.f32 %v859_v38, 0.0  ;;  %2705 = vpow2.f32 %v1039_v17  ;;  %v844_v30 = vmul.f32 2.0, %v789_v27 }
 0x11f   : > { %v1021_v29 = vmul.f32 0.5, %v1005_v18  ;;  %v874_v28 = vmax.f32 %v858_v19, 0.0  ;;  %v2696_v31 = vpop.eup %2695  ;;  %v861_v36 = vsub.f32 %v3214_v58, %v845_v24  ;;  %v943_v24 = vpop.permute.xlu1 %942 }
 0x120   : > { %v1045_v33 = vmul.f32 1.442695, %v1022_v54  ;;  %vm976_vm2 = vcmp.le.f32.partialorder %v875_v23, 6.25  ;;  %v1008_v35 = vsub.f32 0.0, %v875_v23  ;;  %v2698_v39 = vpop.eup %2697  ;;  %v860_v43 = vsub.f32 %v3216_v60, %v844_v30  ;;  %v2401_v46 = vpop.f32.mrb[12].mxu0 }
 0x121   : > { %v1043_v1 = vmul.f32 1.442695, %v1021_v29  ;;  %vm975_vm11 = vcmp.le.f32.partialorder %v874_v28, 6.25  ;;  %v1007_v42 = vsub.f32 0.0, %v874_v28  ;;  %vm3333_vm12 = vmand %vm960_vm4, %vm976_vm2  ;;  %v877_v50 = vmax.f32 %v861_v36, 0.0  ;;  %v799_v51 = vpop.f32.mrb[13].mxu0 }
 0x122   : > { %2707 = vpow2.f32 %v1045_v33  ;;  %v1024_v58 = vmul.f32 0.5, %v1008_v35  ;;  %v847_v44 = vmul.f32 2.0, %v2401_v46  ;;  %vm3340_vm14 = vmand %vm959_vm9, %vm975_vm11  ;;  %v876_v57 = vmax.f32 %v860_v43, 0.0 }
 0x123   : > { %2709 = vpow2.f32 %v1043_v1  ;;  %v1023_v60 = vmul.f32 0.5, %v1007_v42  ;;  %v846_v34 = vmul.f32 2.0, %v799_v51  ;;  %v2700_v59 = vpop.eup %2699  ;;  %vm978_vm10 = vcmp.le.f32.partialorder %v877_v50, 6.25  ;;  %v2727_v1 = vld [vmem:[%s3681_s7] sm:$0xff] (!%p2230_p4)  }
 0x124   : > { %v1049_v61 = vmul.f32 1.442695, %v1024_v58  ;;  %v1010_v32 = vsub.f32 0.0, %v877_v50  ;;  %v863_v2 = vsub.f32 %v3220_v63, %v847_v44  ;;  %v2702_v3 = vpop.eup %2701  ;;  %vm977_vm9 = vcmp.le.f32.partialorder %v876_v57, 6.25  ;;  %v2404_v53 = vpop.f32.mrb[14].mxu0  ;;  %vm3355_vm11 = vmand %vm962_vm6, %vm978_vm10  ;;  %2469 = vmatprep.subr.bf16.mxu1 (!%p2230_p4), %v2727_v1 }
 0x125   : > { %v1047_v4 = vmul.f32 1.442695, %v1023_v60  ;;  %v1009_v6 = vsub.f32 0.0, %v876_v57  ;;  %v862_v8 = vsub.f32 %v3222_v0, %v846_v34  ;;  %v2207_v13 = vpack.c.bf16 %v2696_v31, %v2698_v39  ;;  %v809_v25 = vpop.f32.mrb[15].mxu0  ;;  %v1081_v60 = vld [vmem:[#allocation2 + $0x10] sm:$0xff]  ;;  %v1079_v57 = vld [vmem:[#allocation2] sm:$0xff] }
 0x126   : > { %2711 = vpow2.f32 %v1049_v61  ;;  %v1026_v11 = vmul.f32 0.5, %v1010_v32  ;;  %v879_v48 = vmax.f32 %v863_v2, 0.0  ;;  %vm3741_vm2 = vcmp.eq.s32.totalorder %v3187_v37, %v3210_v55  ;;  %v1080_v2 = vld [vmem:[#allocation2 + $0x8] sm:$0xff] }
 0x127   : > { %vm3362_vm4 = vmand %vm3741_vm2, %vm977_vm9  ;;  %v3742_v63 = vmov 0  ;;  %2713 = vpow2.f32 %v1047_v4  ;;  %v1025_v0 = vmul.f32 0.5, %v1009_v6  ;;  %v878_v14 = vmax.f32 %v862_v8, 0.0  ;;  %v2704_v15 = vpop.eup %2703  ;;  %v1085_v6 = vld [vmem:[#allocation2 + $0x30] sm:$0xff] }
 0x128   : > { %v3743_v63 = vsel %vm3362_vm4, 4294967295, %v3742_v63  ;;  %v849_v40 = vmul.f32 2.0, %v2404_v53  ;;  %v1053_v38 = vmul.f32 1.442695, %v1026_v11  ;;  %vm980_vm6 = vcmp.le.f32.partialorder %v879_v48, 6.25  ;;  %vm3744_vm2 = vmpackc.low %vm3236_vm7, %vm3242_vm8  ;;  %v2706_v18 = vpop.eup %2705 }
 0x129   : > { %v1012_v17 = vsub.f32 0.0, %v879_v48  ;;  %2421 = vmatprep.mubr.msk.bf16.mxu0 %vm3744_vm2, %v2207_v13  ;;  %v848_v37 = vmul.f32 2.0, %v809_v25  ;;  %v1051_v19 = vmul.f32 1.442695, %v1025_v0  ;;  %vm979_vm9 = vcmp.le.f32.partialorder %v878_v14, 6.25  ;;  %v1086_v13 = vld [vmem:[#allocation2 + $0x38] sm:$0xff] }
 0x12a   : > { %v1011_v21 = vsub.f32 0.0, %v878_v14  ;;  %v865_v54 = vsub.f32 %v3227_v9, %v849_v40  ;;  %vm3745_vm10 = vcmp.eq.s32.totalorder %v3195_v47, %v3210_v55  ;;  %2715 = vpow2.f32 %v1053_v38  ;;  %v1084_v0 = vld [vmem:[#allocation2 + $0x28] sm:$0xff] }
 0x12b   : > { %vm3379_vm4 = vmand %vm3745_vm10, %vm980_vm6  ;;  %v1028_v16 = vmul.f32 0.5, %v1012_v17  ;;  %v864_v20 = vsub.f32 %v3224_v5, %v848_v37  ;;  %v2210_v27 = vpack.c.bf16 %v2700_v59, %v2702_v3  ;;  %vm3748_vm7 = vcmp.eq.s32.totalorder %v3218_v62, %v3210_v55  ;;  %v1082_v59 = vld [vmem:[#allocation2 + $0x18] sm:$0xff]  ;;  %v1089_v37 = vld [vmem:[#allocation2 + $0x50] sm:$0xff] }
 0x12c   : > { %vm3387_vm8 = vmand %vm3748_vm7, %vm979_vm9  ;;  %v3749_v29 = vmov 0  ;;  %2717 = vpow2.f32 %v1051_v19  ;;  %v1027_v9 = vmul.f32 0.5, %v1011_v21  ;;  %v881_v47 = vmax.f32 %v865_v54, 0.0  ;;  %v2708_v30 = vpop.eup %2707  ;;  %v1090_v21 = vld [vmem:[#allocation2 + $0x58] sm:$0xff] }
 0x12d   : > { %v3750_v29 = vsel %vm3387_vm8, 4294967295, %v3749_v29  ;;  %v2213_v28 = vpack.c.bf16 %v2704_v15, %v2706_v18  ;;  %v1057_v31 = vmul.f32 1.442695, %v1028_v16  ;;  %v880_v5 = vmax.f32 %v864_v20, 0.0  ;;  %vm3751_vm6 = vmpackc.low %vm3260_vm0, %vm3266_vm1  ;;  %v2710_v62 = vpop.eup %2709  ;;  %v1087_v18 = vld [vmem:[#allocation2 + $0x40] sm:$0xff] }
 0x12e   : > { %2422 = vmatmul.mubr.msk.bf16.vlgmr.msra.gmra.mrb[16].mxu0 %vm3751_vm6, %v2210_v27  ;;  %vm965_vm2 = vcmp.eq.s32.totalorder %v943_v24, %v3210_v55  ;;  %v1055_v33 = vmul.f32 1.442695, %v1027_v9  ;;  %v1014_v35 = vsub.f32 0.0, %v881_v47  ;;  %vm982_vm9 = vcmp.le.f32.partialorder %v881_v47, 6.25  ;;  %vm3752_vm7 = vmpackc.low %vm3283_vm13, %vm3290_vm15  ;;  %v1088_v24 = vld [vmem:[#allocation2 + $0x48] sm:$0xff]  ;;  %v1093_v47 = vld [vmem:[#allocation2 + $0x70] sm:$0xff] }
 0x12f   : > { %2425 = vmatprep.mubr.msk.bf16.mxu1 %vm3752_vm7, %v2213_v28  ;;  %2719 = vpow2.f32 %v1057_v31  ;;  %v1013_v36 = vsub.f32 0.0, %v880_v5  ;;  %vm981_vm10 = vcmp.le.f32.partialorder %v880_v5, 6.25  ;;  %vm3753_vm8 = vcmp.eq.s32.totalorder %v3325_v26, %v3210_v55  ;;  %vm3758_vm15 = vmpackc.low %vm3307_vm3, %vm3316_vm5  ;;  %v1091_v28 = vld [vmem:[#allocation2 + $0x60] sm:$0xff]  ;;  %v1094_v31 = vld [vmem:[#allocation2 + $0x78] sm:$0xff] }
 0x130   : > { %vm3409_vm0 = vmand %vm3753_vm8, %vm982_vm9  ;;  %v2216_v45 = vpack.c.bf16 %v2708_v30, %v2710_v62  ;;  %2721 = vpow2.f32 %v1055_v33  ;;  %v1030_v39 = vmul.f32 0.5, %v1014_v35  ;;  %v2712_v7 = vpop.eup %2711  ;;  %vm3760_vm3 = vnez %v3743_v63  ;;  %v1092_v33 = vld [vmem:[#allocation2 + $0x68] sm:$0xff] }
 0x131   : > { %vm3413_vm1 = vmand %vm965_vm2, %vm981_vm10  ;;  %v1029_v12 = vmul.f32 0.5, %v1013_v36  ;;  %v2714_v55 = vpop.eup %2713  ;;  %vm3762_vm10 = vnez %v3750_v29 }
 0x132   : > { %vm2227_vm13 = vmpackc.low %vm3409_vm0, %vm3413_vm1  ;;  %2426 = vmatmul.mubr.msk.bf16.vlgmr.msra.gmra.mrb[0].mxu1 %vm3758_vm15, %v2216_v45  ;;  %v1061_v26 = vmul.f32 1.442695, %v1030_v39  ;;  %v2219_v43 = vpack.c.bf16 %v2712_v7, %v2714_v55  ;;  %v2728_v7 = vld [vmem:[%s3681_s7 + $0x8] sm:$0xff] (!%p2230_p4)   ;;  %v2733_v55 = vld [vmem:[%s3680_s6] sm:$0xff] (!%p2230_p4)  }
 0x133   : > { %v1059_v42 = vmul.f32 1.442695, %v1029_v12  ;;  %vm3759_vm8 = vmpackc.low %vm3333_vm12, %vm3340_vm14  ;;  %2470 = vmatpush3.bf16.msra.mxu1 (!%p2230_p4), %v2727_v1  ;;  %v2729_v12 = vld [vmem:[%s3681_s7 + $0x10] sm:$0xff] (!%p2230_p4)   ;;  %2437 = vmatprep.subr.bf16.mxu0 (!%p2230_p4), %v2733_v55  ;;  %vm2914_vm12 = vmmov (!%p2230_p4), 0  }
 0x134   : > { %2723 = vpow2.f32 %v1061_v26  ;;  %v2716_v46 = vpop.eup %2715  ;;  %2429 = vmatprep.mubr.msk.bf16.mxu1 %vm3759_vm8, %v2219_v43  ;;  %vm3761_vm5 = vmpackc.low %vm3355_vm11, %vm3760_vm3  ;;  %2471 = vmatprep.subr.bf16.mxu1 (!%p2230_p4), %v2728_v7  ;;  %v2730_v26 = vld [vmem:[%s3681_s7 + $0x18] sm:$0xff] (!%p2230_p4)   ;;  %v2737_v43 = vld [vmem:[%s3680_s6 + $0x10] sm:$0xff] (!%p2230_p4)  }
 0x135   : > { %2725 = vpow2.f32 %v1059_v42  ;;  %vm3763_vm6 = vmpackc.low %vm3379_vm4, %vm3762_vm10  ;;  %v2735_v42 = vld [vmem:[%s3680_s6 + $0x8] sm:$0xff] (!%p2230_p4)   ;;  %2438 = vmatpush3.bf16.msra.mxu0 (!%p2230_p4), %v2733_v55 }
 0x136   : > { %v2718_v58 = vpop.eup %2717  ;;  %2439 = vmatprep.subr.bf16.mxu0 (!%p2230_p4), %v2735_v42 }
 0x137   : > { %v2222_v50 = vpack.c.bf16 %v2716_v46, %v2718_v58  ;;  %2472 = vmatpush3.bf16.msra.mxu1 (!%p2230_p4), %v2728_v7 }
 0x138   : > { %2473 = vmatprep.subr.bf16.mxu1 (!%p2230_p4), %v2729_v12 }
 0x139   : > { %v2720_v22 = vpop.eup %2719  ;;  %2440 = vmatpush3.bf16.msra.mxu0 (!%p2230_p4), %v2735_v42 }
 0x13a   : > { %2430 = vmatmul.mubr.msk.bf16.gmra.mrb[4].mxu1 %vm3761_vm5, %v2222_v50  ;;  %v2722_v56 = vpop.eup %2721  ;;  %v2731_v50 = vld [vmem:[%s3681_s7 + $0x20] sm:$0xff] (!%p2230_p4)   ;;  %2441 = vmatprep.subr.bf16.mxu0 (!%p2230_p4), %v2737_v43 }
 0x13b   : > { %v2225_v44 = vpack.c.bf16 %v2720_v22, %v2722_v56  ;;  %2474 = vmatpush3.bf16.msra.mxu1 (!%p2230_p4), %v2729_v12  ;;  %v2738_v56 = vld [vmem:[%s3680_s6 + $0x18] sm:$0xff] (!%p2230_p4)  }
 0x13c   : > { %2475 = vmatprep.subr.bf16.mxu1 (!%p2230_p4), %v2730_v26 }
 0x13d   : > { %2433 = vmatprep.mubr.msk.bf16.mxu1 %vm3763_vm6, %v2225_v44  ;;  %v2732_v44 = vld [vmem:[%s3681_s7 + $0x28] sm:$0xff] (!%p2230_p4)   ;;  %2442 = vmatpush3.bf16.msra.mxu0 (!%p2230_p4), %v2737_v43 }
 0x13e   : > { %v2724_v49 = vpop.eup %2723  ;;  %2443 = vmatprep.subr.bf16.mxu0 (!%p2230_p4), %v2738_v56 }
 0x13f   : > { %v2726_v51 = vpop.eup %2725  ;;  %2476 = vmatpush3.bf16.msra.mxu1 (!%p2230_p4), %v2730_v26 }
 0x140   : > { %v2228_v52 = vpack.c.bf16 %v2724_v49, %v2726_v51  ;;  %2477 = vmatprep.subr.bf16.mxu1 (!%p2230_p4), %v2731_v50  ;;  %v2739_v49 = vld [vmem:[%s3680_s6 + $0x20] sm:$0xff] (!%p2230_p4)   ;;  %v2734_v51 = vld [vmem:[%s3681_s7 + $0x30] sm:$0xff] (!%p2230_p4)  }
 0x141   : > { %2444 = vmatpush3.bf16.msra.mxu0 (!%p2230_p4), %v2738_v56 }
 0x142   : > { %2434 = vmatmul.mubr.msk.bf16.gmra.mrb[8].mxu1 %vm2227_vm13, %v2228_v52  ;;  %v2740_v52 = vld [vmem:[%s3680_s6 + $0x28] sm:$0xff] (!%p2230_p4)   ;;  %2445 = vmatprep.subr.bf16.mxu0 (!%p2230_p4), %v2739_v49 }
 0x143   : > { %2478 = vmatpush3.bf16.msra.mxu1 (!%p2230_p4), %v2731_v50 }
 0x144   : > { %2479 = vmatprep.subr.bf16.mxu1 (!%p2230_p4), %v2732_v44 }
 0x145   : > { %2446 = vmatpush3.bf16.msra.mxu0 (!%p2230_p4), %v2739_v49 }
 0x146   : > { %2447 = vmatprep.subr.bf16.mxu0 (!%p2230_p4), %v2740_v52 }
 0x147   : > { %2480 = vmatpush3.bf16.msra.mxu1 (!%p2230_p4), %v2732_v44 }
 0x148   : > { %2481 = vmatprep.subr.bf16.mxu1 (!%p2230_p4), %v2734_v51 }
 0x149   : > { %2448 = vmatpush3.bf16.msra.mxu0 (!%p2230_p4), %v2740_v52 }
 0x14b   : > { %2482 = vmatpush3.bf16.msra.mxu1 (!%p2230_p4), %v2734_v51 }
 0x201   : > { %v2423_v34 = vpop.f32.mrb[16].mxu0 }
 0x202   : > { %v1266_v61 = vadd.f32 %v2423_v34, %v1081_v60  ;;  %v1201_v32 = vpop.f32.mrb[17].mxu0  ;;  %v2736_v60 = vld [vmem:[%s3681_s7 + $0x38] sm:$0xff] (!%p2230_p4)  }
 0x203   : > { %v1264_v3 = vadd.f32 %v1201_v32, %v1079_v57  ;;  %v2424_v4 = vpop.f32.mrb[18].mxu0  ;;  %v2741_v57 = vld [vmem:[%s3680_s6 + $0x30] sm:$0xff] (!%p2230_p4)   ;;  %2483 = vmatprep.subr.bf16.mxu1 (!%p2230_p4), %v2736_v60 }
 0x204   : > { %1282 = vst [vmem:[#allocation2 + $0x10] sm:$0xff] %v1266_v61  ;;  %v1267_v8 = vadd.f32 %v2424_v4, %v1082_v59  ;;  %v1204_v53 = vpop.f32.mrb[19].mxu0  ;;  %2449 = vmatprep.subr.bf16.mxu0 (!%p2230_p4), %v2741_v57  ;;  %2484 = vmatpush3.bf16.msra.mxu1 (!%p2230_p4), %v2736_v60 }
 0x205   : > { %1280 = vst [vmem:[#allocation2] sm:$0xff] %v1264_v3  ;;  %v1265_v11 = vadd.f32 %v1204_v53, %v1080_v2  ;;  %v2427_v48 = vpop.f32.mrb[0].mxu1  ;;  %v2742_v3 = vld [vmem:[%s3680_s6 + $0x38] sm:$0xff] (!%p2230_p4)   ;;  %2450 = vmatpush3.bf16.msra.mxu0 (!%p2230_p4), %v2741_v57 }
 0x206   : > { %1283 = vst [vmem:[#allocation2 + $0x18] sm:$0xff] %v1267_v8  ;;  %v1270_v25 = vadd.f32 %v2427_v48, %v1085_v6  ;;  %v1217_v63 = vpop.f32.mrb[1].mxu1  ;;  %2451 = vmatprep.subr.bf16.mxu0 (!%p2230_p4), %v2742_v3 }
 0x207   : > { %1281 = vst [vmem:[#allocation2 + $0x8] sm:$0xff] %v1265_v11  ;;  %v1268_v14 = vadd.f32 %v1217_v63, %v1083_v10  ;;  %v2428_v40 = vpop.f32.mrb[2].mxu1 }
 0x208   : > { %1286 = vst [vmem:[#allocation2 + $0x30] sm:$0xff] %v1270_v25  ;;  %v1271_v15 = vadd.f32 %v2428_v40, %v1086_v13  ;;  %v1220_v38 = vpop.f32.mrb[3].mxu1 }
 0x209   : > { %1284 = vst [vmem:[#allocation2 + $0x20] sm:$0xff] %v1268_v14  ;;  %v1269_v17 = vadd.f32 %v1220_v38, %v1084_v0  ;;  %2452 = vmatpush3.bf16.msra.mxu0 (!%p2230_p4), %v2742_v3 }
 0x20a   : > { %1287 = vst [vmem:[#allocation2 + $0x38] sm:$0xff] %v1271_v15 }
 0x20b   : > { %1285 = vst [vmem:[#allocation2 + $0x28] sm:$0xff] %v1269_v17  ;;  %v1302_v34 = vld [vmem:[#allocation2 + $0x10] sm:$0xff] (!%p2230_p4) }
 0x20c   : > { %v1300_v46 = vld [vmem:[#allocation2] sm:$0xff] (!%p2230_p4) }
 0x20d   : > { %v2431_v19 = vpop.f32.mrb[4].mxu1  ;;  %v1303_v59 = vld [vmem:[#allocation2 + $0x18] sm:$0xff] (!%p2230_p4) }
 0x20e   : > { %v1274_v54 = vadd.f32 %v2431_v19, %v1089_v37  ;;  %v1233_v23 = vpop.f32.mrb[5].mxu1  ;;  %v1301_v58 = vld [vmem:[#allocation2 + $0x8] sm:$0xff] (!%p2230_p4)  ;;  %v1317_v2 = vpack.c.bf16 (!%p2230_p4), %v1303_v59, %v1302_v34  ;;  %v2743_v37 = vld [vmem:[%s3684_s10] sm:$0xff] (!%p2230_p4)   ;;  %v2745_v19 = vld [vmem:[%s3684_s10 + $0x10] sm:$0xff] (!%p2230_p4)  }
 0x20f   : > { %v1272_v16 = vadd.f32 %v1233_v23, %v1087_v18  ;;  %v2432_v20 = vpop.f32.mrb[6].mxu1  ;;  %v1316_v22 = vpack.c.bf16 (!%p2230_p4), %v1301_v58, %v1300_v46  ;;  %v1306_v6 = vld [vmem:[#allocation2 + $0x30] sm:$0xff] (!%p2230_p4)  ;;  %2501 = vmatprep.subr.bf16.mxu0 (!%p2230_p4), %v2743_v37  ;;  %v2744_v18 = vld [vmem:[%s3684_s10 + $0x8] sm:$0xff] (!%p2230_p4)  }
 0x210   : > { %1290 = vst [vmem:[#allocation2 + $0x50] sm:$0xff] %v1274_v54  ;;  %v1275_v27 = vadd.f32 %v2432_v20, %v1090_v21  ;;  %v1236_v29 = vpop.f32.mrb[7].mxu1  ;;  %v1304_v61 = vld [vmem:[#allocation2 + $0x20] sm:$0xff] (!%p2230_p4)  ;;  %v2746_v21 = vld [vmem:[%s3684_s10 + $0x18] sm:$0xff] (!%p2230_p4)   ;;  %v2747_v54 = vld [vmem:[%s3684_s10 + $0x20] sm:$0xff] (!%p2230_p4)  }
 0x211   : > { %1288 = vst [vmem:[#allocation2 + $0x40] sm:$0xff] %v1272_v16  ;;  %v1273_v9 = vadd.f32 %v1236_v29, %v1088_v24  ;;  %2485 = vmatprep.mubr.bf16.mxu1 (!%p2230_p4), %v1316_v22  ;;  %2453 = vmatprep.mubr.bf16.mxu0 (!%p2230_p4), %v1316_v22  ;;  %v1307_v8 = vld [vmem:[#allocation2 + $0x38] sm:$0xff] (!%p2230_p4)  ;;  %v2749_v24 = vld [vmem:[%s3684_s10 + $0x30] sm:$0xff] (!%p2230_p4)   ;;  %v2750_v16 = vld [vmem:[%s3684_s10 + $0x38] sm:$0xff] (!%p2230_p4)  }
 0x212   : > { %1291 = vst [vmem:[#allocation2 + $0x58] sm:$0xff] %v1275_v27  ;;  %v1305_v32 = vld [vmem:[#allocation2 + $0x28] sm:$0xff] (!%p2230_p4)  ;;  %2486 = vmatmul.mubr.bf16.vlgmr.msra.gmra.mrb[0].mxu1 (!%p2230_p4), %v1317_v2  ;;  %v1319_v11 = vpack.c.bf16 (!%p2230_p4), %v1307_v8, %v1306_v6  ;;  %2454 = vmatmul.mubr.bf16.vlgmr.msra.gmra.mrb[0].mxu0 (!%p2230_p4), %v1317_v2  ;;  %v2748_v23 = vld [vmem:[%s3684_s10 + $0x28] sm:$0xff] (!%p2230_p4)   ;;  %v3522_v20 = vld [vmem:[%s3683_s9] ss:$0 sm:$0xff] (!%p2230_p4) }
 0x213   : > { %1289 = vst [vmem:[#allocation2 + $0x48] sm:$0xff] %v1273_v9  ;;  %v1318_v4 = vpack.c.bf16 (!%p2230_p4), %v1305_v32, %v1304_v61  ;;  %2502 = vmatpush3.bf16.msra.mxu0 (!%p2230_p4), %v2743_v37 }
 0x214   : > { %2503 = vmatprep.subr.bf16.mxu0 (!%p2230_p4), %v2744_v18 }
 0x215   : > { %v2435_v30 = vpop.f32.mrb[8].mxu1  ;;  %1299 = sbr.rel (%p2230_p4) target bundleno = 1242 (0x4da), region = 76  ;;  %2489 = vmatprep.mubr.bf16.mxu1 (!%p2230_p4), %v1318_v4  ;;  %2457 = vmatprep.mubr.bf16.mxu0 (!%p2230_p4), %v1318_v4 }
 0x216   : > { %v1278_v5 = vadd.f32 %v2435_v30, %v1093_v47  ;;  %v1249_v62 = vpop.f32.mrb[9].mxu1 }
 0x217   : > { %v1276_v35 = vadd.f32 %v1249_v62, %v1091_v28  ;;  %v2436_v36 = vpop.f32.mrb[10].mxu1  ;;  %v1310_v13 = vld [vmem:[#allocation2 + $0x50] sm:$0xff] (!%p2230_p4)  ;;  %2504 = vmatpush3.bf16.msra.mxu0 (!%p2230_p4), %v2744_v18 }
 0x218   : > { %1294 = vst [vmem:[#allocation2 + $0x70] sm:$0xff] %v1278_v5  ;;  %v1279_v41 = vadd.f32 %v2436_v36, %v1094_v31  ;;  %v1252_v45 = vpop.f32.mrb[11].mxu1  ;;  %v1308_v53 = vld [vmem:[#allocation2 + $0x40] sm:$0xff] (!%p2230_p4)  ;;  %2505 = vmatprep.subr.bf16.mxu0 (!%p2230_p4), %v2745_v19 }
 0x219   : > { %1292 = vst [vmem:[#allocation2 + $0x60] sm:$0xff] %v1276_v35  ;;  %v1277_v39 = vadd.f32 %v1252_v45, %v1092_v33  ;;  %v1311_v25 = vld [vmem:[#allocation2 + $0x58] sm:$0xff] (!%p2230_p4) }
 0x21a   : > { %1295 = vst [vmem:[#allocation2 + $0x78] sm:$0xff] %v1279_v41  ;;  %v1309_v10 = vld [vmem:[#allocation2 + $0x48] sm:$0xff] (!%p2230_p4)  ;;  %2490 = vmatmul.mubr.bf16.gmra.mrb[4].mxu1 (!%p2230_p4), %v1319_v11  ;;  %v1321_v14 = vpack.c.bf16 (!%p2230_p4), %v1311_v25, %v1310_v13  ;;  %2458 = vmatmul.mubr.bf16.gmra.mrb[4].mxu0 (!%p2230_p4), %v1319_v11 }
 0x21b   : > { %1293 = vst [vmem:[#allocation2 + $0x68] sm:$0xff] %v1277_v39  ;;  %v1320_v48 = vpack.c.bf16 (!%p2230_p4), %v1309_v10, %v1308_v53  ;;  %2506 = vmatpush3.bf16.msra.mxu0 (!%p2230_p4), %v2745_v19 }
 0x21c   : > { %2507 = vmatprep.subr.bf16.mxu0 %v2746_v21 }
 0x21d   : > { %2493 = vmatprep.mubr.bf16.mxu1 %v1320_v48  ;;  %2461 = vmatprep.mubr.bf16.mxu0 %v1320_v48 }
 0x21f   : > { %v1314_v15 = vld [vmem:[#allocation2 + $0x70] sm:$0xff]  ;;  %2508 = vmatpush3.bf16.msra.mxu0 %v2746_v21 }
 0x220   : > { %v1312_v63 = vld [vmem:[#allocation2 + $0x60] sm:$0xff]  ;;  %2509 = vmatprep.subr.bf16.mxu0 %v2747_v54 }
 0x221   : > { %v1315_v38 = vld [vmem:[#allocation2 + $0x78] sm:$0xff] }
 0x222   : > { %v1313_v0 = vld [vmem:[#allocation2 + $0x68] sm:$0xff]  ;;  %2494 = vmatmul.mubr.bf16.gmra.mrb[8].mxu1 %v1321_v14  ;;  %v1323_v17 = vpack.c.bf16 %v1315_v38, %v1314_v15  ;;  %2462 = vmatmul.mubr.bf16.gmra.mrb[8].mxu0 %v1321_v14  ;;  %v3555_v15 = vld [vmem:[%s3682_s8] ss:$0 sm:$0xff] }
 0x223   : > { %v1322_v40 = vpack.c.bf16 %v1313_v0, %v1312_v63  ;;  %2510 = vmatpush3.bf16.msra.mxu0 %v2747_v54 }
 0x224   : > { %2511 = vmatprep.subr.bf16.mxu0 %v2748_v23 }
 0x225   : > { %2497 = vmatprep.mubr.bf16.mxu1 %v1322_v40  ;;  %2465 = vmatprep.mubr.bf16.mxu0 %v1322_v40 }
 0x227   : > { %2512 = vmatpush3.bf16.msra.mxu0 %v2748_v23 }
 0x228   : > { %2513 = vmatprep.subr.bf16.mxu0 %v2749_v24 }
 0x22a   : > { %2498 = vmatmul.mubr.bf16.gmra.mrb[12].mxu1 %v1323_v17  ;;  %2466 = vmatmul.mubr.bf16.gmra.mrb[12].mxu0 %v1323_v17 }
 0x22b   : > { %2514 = vmatpush3.bf16.msra.mxu0 %v2749_v24 }
 0x22c   : > { %2515 = vmatprep.subr.bf16.mxu0 %v2750_v16 }
 0x22f   : > { %2516 = vmatpush3.bf16.msra.mxu0 %v2750_v16 }
 0x2e5   : > { %v2487_v27 = vpop.f32.mrb[0].mxu1  ;;  %v3528_v41 = vpop.f32.mrb[0].mxu0 }
 0x2e6   : > { %v1606_v29 = vadd.f32 %v2487_v27, %v3522_v20  ;;  %v1597_v9 = vpop.f32.mrb[1].mxu1  ;;  %v3530_v45 = vpop.f32.mrb[1].mxu0  ;;  %v1438_v16 = vadd.f32 %v3528_v41, %v3555_v15 }
 0x2e7   : > { %v1598_v47 = vadd.f32 %v3522_v20, %v1597_v9  ;;  %v2488_v28 = vpop.f32.mrb[2].mxu1  ;;  %v3532_v1 = vpop.f32.mrb[2].mxu0 }
 0x2e8   : > { %v2251_v30 = vmul.f32 -1.442695, %v1606_v29  ;;  %v1609_v31 = vadd.f32 %v2488_v28, %v3522_v20  ;;  %v1600_v5 = vpop.f32.mrb[3].mxu1  ;;  %v3535_v55 = vpop.f32.mrb[3].mxu0 }
 0x2e9   : > { %v2249_v62 = vmul.f32 -1.442695, %v1598_v47  ;;  %v1601_v33 = vadd.f32 %v3522_v20, %v1600_v5 }
 0x2ea   : > { %2751 = vpow2.f32 %v2251_v30  ;;  %v2252_v35 = vmul.f32 -1.442695, %v1609_v31  ;;  %v1430_v30 = vadd.f32 %v3555_v15, %v3530_v45  ;;  %v1441_v45 = vadd.f32 %v3532_v1, %v3555_v15 }
 0x2eb   : > { %2753 = vpow2.f32 %v2249_v62  ;;  %v2250_v36 = vmul.f32 -1.442695, %v1601_v33 }
 0x2ec   : > { %2755 = vpow2.f32 %v2252_v35 }
 0x2ed   : > { %2757 = vpow2.f32 %v2250_v36  ;;  %v2491_v39 = vpop.f32.mrb[4].mxu1  ;;  %v3540_v49 = vpop.f32.mrb[4].mxu0 }
 0x2ee   : > { %v1622_v7 = vadd.f32 %v2491_v39, %v3522_v20  ;;  %v1613_v12 = vpop.f32.mrb[5].mxu1  ;;  %v3542_v52 = vpop.f32.mrb[5].mxu0 }
 0x2ef   : > { %v1614_v26 = vadd.f32 %v3522_v20, %v1613_v12  ;;  %v2492_v42 = vpop.f32.mrb[6].mxu1  ;;  %v3544_v59 = vpop.f32.mrb[6].mxu0 }
 0x2f0   : > { %v2255_v43 = vmul.f32 -1.442695, %v1622_v7  ;;  %v1625_v46 = vadd.f32 %v2492_v42, %v3522_v20  ;;  %v1616_v58 = vpop.f32.mrb[7].mxu1  ;;  %v3547_v4 = vpop.f32.mrb[7].mxu0 }
 0x2f1   : > { %v2253_v50 = vmul.f32 -1.442695, %v1614_v26  ;;  %v1617_v22 = vadd.f32 %v3522_v20, %v1616_v58  ;;  %v1433_v58 = vadd.f32 %v3555_v15, %v3535_v55  ;;  %v1454_v55 = vadd.f32 %v3540_v49, %v3555_v15 }
 0x2f2   : > { %2759 = vpow2.f32 %v2255_v43  ;;  %v2256_v56 = vmul.f32 -1.442695, %v1625_v46  ;;  %v1457_v49 = vadd.f32 %v3544_v59, %v3555_v15 }
 0x2f3   : > { %2761 = vpow2.f32 %v2253_v50  ;;  %v2254_v44 = vmul.f32 -1.442695, %v1617_v22 }
 0x2f4   : > { %v2752_v51 = vpop.eup %2751  ;;  %2763 = vpow2.f32 %v2256_v56 }
 0x2f5   : > { %v2754_v60 = vpop.eup %2753  ;;  %v1710_v57 = vadd.f32 1.0, %v2752_v51  ;;  %2765 = vpow2.f32 %v2254_v44  ;;  %v2495_v34 = vpop.f32.mrb[8].mxu1 }
 0x2f6   : > { %v2756_v61 = vpop.eup %2755  ;;  %v1708_v32 = vadd.f32 1.0, %v2754_v60  ;;  %v1638_v2 = vadd.f32 %v2495_v34, %v3522_v20  ;;  %v1629_v3 = vpop.f32.mrb[9].mxu1 }
 0x2f7   : > { %v2758_v6 = vpop.eup %2757  ;;  %2767 = vrcp.f32 %v1710_v57  ;;  %v1711_v8 = vadd.f32 1.0, %v2756_v61  ;;  %v1630_v53 = vadd.f32 %v3522_v20, %v1629_v3  ;;  %v2496_v10 = vpop.f32.mrb[10].mxu1 }
 0x2f8   : > { %2769 = vrcp.f32 %v1708_v32  ;;  %v1709_v11 = vadd.f32 1.0, %v2758_v6  ;;  %v2259_v48 = vmul.f32 -1.442695, %v1638_v2  ;;  %v1641_v13 = vadd.f32 %v2496_v10, %v3522_v20  ;;  %v1632_v25 = vpop.f32.mrb[11].mxu1  ;;  %v3557_v38 = vpop.f32.mrb[8].mxu0 }
 0x2f9   : > { %2771 = vrcp.f32 %v1711_v8  ;;  %v2257_v63 = vmul.f32 -1.442695, %v1630_v53  ;;  %v1633_v0 = vadd.f32 %v3522_v20, %v1632_v25  ;;  %v3559_v37 = vpop.f32.mrb[9].mxu0  ;;  %v1446_v6 = vadd.f32 %v3555_v15, %v3542_v52 }
 0x2fa   : > { %2773 = vrcp.f32 %v1709_v11  ;;  %v2260_v14 = vmul.f32 -1.442695, %v1641_v13  ;;  %v3561_v54 = vpop.f32.mrb[10].mxu0  ;;  %v1449_v52 = vadd.f32 %v3555_v15, %v3547_v4 }
 0x2fb   : > { %2775 = vpow2.f32 %v2259_v48  ;;  %v2258_v40 = vmul.f32 -1.442695, %v1633_v0  ;;  %v3566_v9 = vpop.f32.mrb[11].mxu0 }
 0x2fc   : > { %v2760_v17 = vpop.eup %2759  ;;  %2777 = vpow2.f32 %v2257_v63 }
 0x2fd   : > { %v2762_v18 = vpop.eup %2761  ;;  %v1714_v19 = vadd.f32 1.0, %v2760_v17  ;;  %2779 = vpow2.f32 %v2260_v14  ;;  %v2499_v21 = vpop.f32.mrb[12].mxu1 }
 0x2fe   : > { %v2764_v23 = vpop.eup %2763  ;;  %v1712_v24 = vadd.f32 1.0, %v2762_v18  ;;  %2781 = vpow2.f32 %v2258_v40  ;;  %v1654_v27 = vadd.f32 %v2499_v21, %v3522_v20  ;;  %v1645_v29 = vpop.f32.mrb[13].mxu1 }
 0x2ff   : > { %v2766_v47 = vpop.eup %2765  ;;  %2783 = vrcp.f32 %v1714_v19  ;;  %v1715_v28 = vadd.f32 1.0, %v2764_v23  ;;  %v1646_v31 = vadd.f32 %v3522_v20, %v1645_v29  ;;  %v2500_v5 = vpop.f32.mrb[14].mxu1 }
 0x300   : > { %2785 = vrcp.f32 %v1712_v24  ;;  %v1713_v62 = vadd.f32 1.0, %v2766_v47  ;;  %v2263_v33 = vmul.f32 -1.442695, %v1654_v27  ;;  %v1657_v35 = vadd.f32 %v2500_v5, %v3522_v20  ;;  %v1648_v36 = vpop.f32.mrb[15].mxu1  ;;  %v3577_v22 = vpop.f32.mrb[12].mxu0 }
 0x301   : > { %v2768_v41 = vpop.eup %2767  ;;  %2787 = vrcp.f32 %v1715_v28  ;;  %v2261_v39 = vmul.f32 -1.442695, %v1646_v31  ;;  %v1649_v7 = vadd.f32 %v3522_v20, %v1648_v36  ;;  %v3579_v20 = vpop.f32.mrb[13].mxu0  ;;  %v1470_v27 = vadd.f32 %v3557_v38, %v3555_v15 }
 0x302   : > { %v2770_v12 = vpop.eup %2769  ;;  %2789 = vrcp.f32 %v1713_v62  ;;  %v1758_v26 = vmul.f32 %v2768_v41, %v1438_v16  ;;  %v2264_v42 = vmul.f32 -1.442695, %v1657_v35  ;;  %v3581_v57 = vpop.f32.mrb[14].mxu0  ;;  %v1462_v28 = vadd.f32 %v3555_v15, %v3559_v37 }
 0x303   : > { %v2772_v43 = vpop.eup %2771  ;;  %v1756_v46 = vmul.f32 %v2770_v12, %v1430_v30  ;;  %2791 = vpow2.f32 %v2263_v33  ;;  %v2262_v50 = vmul.f32 -1.442695, %v1649_v7  ;;  %v3585_v32 = vpop.f32.mrb[15].mxu0  ;;  %v1473_v62 = vadd.f32 %v3561_v54, %v3555_v15 }
 0x304   : > { %v2774_v56 = vpop.eup %2773  ;;  %v1759_v44 = vmul.f32 %v2772_v43, %v1441_v45  ;;  %2793 = vpow2.f32 %v2261_v39  ;;  %v1465_v35 = vadd.f32 %v3555_v15, %v3566_v9  ;;  %v1486_v39 = vadd.f32 %v3577_v22, %v3555_v15 }
 0x305   : > { %v2776_v51 = vpop.eup %2775  ;;  %v1757_v60 = vmul.f32 %v2774_v56, %v1433_v58  ;;  %2795 = vpow2.f32 %v2264_v42  ;;  %v1478_v12 = vadd.f32 %v3555_v15, %v3579_v20  ;;  %v1489_v43 = vadd.f32 %v3581_v57, %v3555_v15  ;;  %v2265_v57 = vld [vmem:[%s3764_s18] ss:$0 sm:$0xff] }
 0x306   : > { %v2778_v1 = vpop.eup %2777  ;;  %v1718_v34 = vadd.f32 1.0, %v2776_v51  ;;  %v1773_v61 = vpack.c.bf16 %v1759_v44, %v1758_v26  ;;  %2797 = vpow2.f32 %v2262_v50  ;;  %v1481_v58 = vadd.f32 %v3555_v15, %v3585_v32 }
 0x307   : > { %v2780_v2 = vpop.eup %2779  ;;  %v1716_v3 = vadd.f32 1.0, %v2778_v1  ;;  %v1772_v8 = vpack.c.bf16 %v1757_v60, %v1756_v46  ;;  %v2913_v20 = vmov 0.0|0.0   ;;  %v2915_v60 = vmov 0.0  }
 0x308   : > { %v2782_v53 = vpop.eup %2781  ;;  %2799 = vrcp.f32 %v1718_v34  ;;  %v1719_v10 = vadd.f32 1.0, %v2780_v2  ;;  %2568 = vmatprep.subr.bf16.mxu1 %v2913_v20  ;;  %2565 = vmatprep.mubr.msk.f32.mxu1 %vm2914_vm12, %v2915_v60 }
 0x309   : > { %v2784_v11 = vpop.eup %2783  ;;  %2801 = vrcp.f32 %v1716_v3  ;;  %v1717_v48 = vadd.f32 1.0, %v2782_v53  ;;  %2517 = vmatprep.mubr.bf16.mxu0 %v1772_v8 }
 0x30a   : > { %v2786_v13 = vpop.eup %2785  ;;  %2803 = vrcp.f32 %v1719_v10  ;;  %v1762_v25 = vmul.f32 %v2784_v11, %v1454_v55  ;;  %2518 = vmatmul.mubr.bf16.vlgmr.msra.gmra.mrb[16].mxu0 %v1773_v61 }
 0x30b   : > { %v2788_v63 = vpop.eup %2787  ;;  %2805 = vrcp.f32 %v1717_v48  ;;  %v1760_v0 = vmul.f32 %v2786_v13, %v1446_v6 }
 0x30c   : > { %v2790_v14 = vpop.eup %2789  ;;  %v1763_v40 = vmul.f32 %v2788_v63, %v1457_v49 }
 0x30d   : > { %v2792_v17 = vpop.eup %2791  ;;  %v1761_v18 = vmul.f32 %v2790_v14, %v1449_v52 }
 0x30e   : > { %v2794_v19 = vpop.eup %2793  ;;  %v1722_v21 = vadd.f32 1.0, %v2792_v17  ;;  %v1775_v23 = vpack.c.bf16 %v1763_v40, %v1762_v25 }
 0x30f   : > { %v2796_v24 = vpop.eup %2795  ;;  %v1720_v16 = vadd.f32 1.0, %v2794_v19  ;;  %v1774_v59 = vpack.c.bf16 %v1761_v18, %v1760_v0 }
 0x310   : > { %v2798_v29 = vpop.eup %2797  ;;  %2807 = vrcp.f32 %v1722_v21  ;;  %v1723_v47 = vadd.f32 1.0, %v2796_v24 }
 0x311   : > { %2809 = vrcp.f32 %v1720_v16  ;;  %v1721_v4 = vadd.f32 1.0, %v2798_v29  ;;  %2521 = vmatprep.mubr.bf16.mxu0 %v1774_v59 }
 0x312   : > { %v2800_v30 = vpop.eup %2799  ;;  %2811 = vrcp.f32 %v1723_v47  ;;  %2522 = vmatmul.mubr.bf16.gmra.mrb[20].mxu0 %v1775_v23 }
 0x313   : > { %v2802_v31 = vpop.eup %2801  ;;  %2813 = vrcp.f32 %v1721_v4  ;;  %v1766_v5 = vmul.f32 %v2800_v30, %v1470_v27 }
 0x314   : > { %v2804_v38 = vpop.eup %2803  ;;  %v1764_v33 = vmul.f32 %v2802_v31, %v1462_v28 }
 0x315   : > { %v2806_v36 = vpop.eup %2805  ;;  %v1767_v41 = vmul.f32 %v2804_v38, %v1473_v62  ;;  %v1948_v62 = vlaneseq }
 0x316   : > { %v1765_v37 = vmul.f32 %v2806_v36, %v1465_v35  ;;  %v2274_v36 = vld [vmem:[%s508_s23] ss:$0 sm:$0xff] }
 0x317   : > { %v1777_v7 = vpack.c.bf16 %v1767_v41, %v1766_v5  ;;  %v1949_v35 = vshrl.u32 %v1948_v62, 7  ;;  %v2916_v41 = vmov 1.0  }
 0x318   : > { %v1776_v26 = vpack.c.bf16 %v1765_v37, %v1764_v33 }
 0x319   : > { %vm1955_vm14 = vcmp.eq.s32.totalorder %v1949_v35, %v2274_v36 }
 0x31a   : > { %v2808_v45 = vpop.eup %2807  ;;  %2525 = vmatprep.mubr.bf16.mxu0 %v1776_v26 }
 0x31b   : > { %v2810_v42 = vpop.eup %2809  ;;  %v1770_v54 = vmul.f32 %v2808_v45, %v1486_v39  ;;  %2526 = vmatmul.mubr.bf16.gmra.mrb[24].mxu0 %v1777_v7 }
 0x31c   : > { %v2812_v9 = vpop.eup %2811  ;;  %v1768_v46 = vmul.f32 %v2810_v42, %v1478_v12 }
 0x31d   : > { %v2814_v50 = vpop.eup %2813  ;;  %v1771_v22 = vmul.f32 %v2812_v9, %v1489_v43 }
 0x31e   : > { %v1769_v56 = vmul.f32 %v2814_v50, %v1481_v58 }
 0x31f   : > { %v1779_v44 = vpack.c.bf16 %v1771_v22, %v1770_v54 }
 0x320   : > { %v1778_v51 = vpack.c.bf16 %v1769_v56, %v1768_v46 }
 0x322   : > { %2529 = vmatprep.mubr.bf16.mxu0 %v1778_v51 }
 0x323   : > { %2530 = vmatmul.mubr.bf16.gmra.mrb[28].mxu0 %v1779_v44 }
 0x3dd   : > { %v2519_v1 = vpop.f32.mrb[16].mxu0 }
 0x3de   : > { %v1885_v34 = vpop.f32.mrb[17].mxu0  ;;  %v1894_v15 = vadd.f32 %v2519_v1, %v2265_v57 }
 0x3df   : > { %v2520_v61 = vpop.f32.mrb[18].mxu0  ;;  %v1886_v2 = vadd.f32 %v2265_v57, %v1885_v34 }
 0x3e0   : > { %v1897_v55 = vadd.f32 %v2520_v61, %v2265_v57  ;;  %v1888_v32 = vpop.f32.mrb[19].mxu0 }
 0x3e1   : > { %v1889_v3 = vadd.f32 %v2265_v57, %v1888_v32 }
 0x3e2   : > { %v2572_v6 = vpack.c.bf16 %v1897_v55, %v1894_v15 }
 0x3e3   : > { %v2569_v8 = vpack.c.bf16 %v1889_v3, %v1886_v2 }
 0x3e5   : > { %v2523_v53 = vpop.f32.mrb[20].mxu0  ;;  %2570 = vmatpush3.bf16.msra.mxu1 %v2569_v8 }
 0x3e6   : > { %v1901_v10 = vpop.f32.mrb[21].mxu0  ;;  %2571 = vmatprep.subr.bf16.mxu1 %v2913_v20  ;;  %v1910_v48 = vadd.f32 %v2523_v53, %v2265_v57 }
 0x3e7   : > { %v2524_v11 = vpop.f32.mrb[22].mxu0  ;;  %v1902_v49 = vadd.f32 %v2265_v57, %v1901_v10 }
 0x3e8   : > { %v1913_v13 = vadd.f32 %v2524_v11, %v2265_v57  ;;  %v1904_v25 = vpop.f32.mrb[23].mxu0 }
 0x3e9   : > { %v1905_v63 = vadd.f32 %v2265_v57, %v1904_v25  ;;  %2573 = vmatpush3.bf16.msra.mxu1 %v2572_v6 }
 0x3ea   : > { %v2578_v0 = vpack.c.bf16 %v1913_v13, %v1910_v48  ;;  %2574 = vmatprep.subr.bf16.mxu1 %v2913_v20 }
 0x3eb   : > { %v2575_v52 = vpack.c.bf16 %v1905_v63, %v1902_v49 }
 0x3ed   : > { %2576 = vmatpush3.bf16.msra.mxu1 %v2575_v52 }
 0x3ee   : > { %v2527_v14 = vpop.f32.mrb[24].mxu0  ;;  %2577 = vmatprep.subr.bf16.mxu1 %v2913_v20 }
 0x3ef   : > { %v1917_v40 = vpop.f32.mrb[25].mxu0  ;;  %v1926_v18 = vadd.f32 %v2527_v14, %v2265_v57 }
 0x3f0   : > { %v2528_v17 = vpop.f32.mrb[26].mxu0  ;;  %v1918_v23 = vadd.f32 %v2265_v57, %v1917_v40 }
 0x3f1   : > { %v1929_v19 = vadd.f32 %v2528_v17, %v2265_v57  ;;  %v1920_v21 = vpop.f32.mrb[27].mxu0  ;;  %2579 = vmatpush3.bf16.msra.mxu1 %v2578_v0 }
 0x3f2   : > { %v1921_v24 = vadd.f32 %v2265_v57, %v1920_v21  ;;  %2580 = vmatprep.subr.bf16.mxu1 %v2913_v20 }
 0x3f3   : > { %v2584_v16 = vpack.c.bf16 %v1929_v19, %v1926_v18 }
 0x3f4   : > { %v2581_v27 = vpack.c.bf16 %v1921_v24, %v1918_v23 }
 0x3f6   : > { %v2531_v59 = vpop.f32.mrb[28].mxu0  ;;  %2582 = vmatpush3.bf16.msra.mxu1 %v2581_v27 }
 0x3f7   : > { %v1933_v29 = vpop.f32.mrb[29].mxu0  ;;  %2583 = vmatprep.subr.bf16.mxu1 %v2913_v20  ;;  %v1942_v28 = vadd.f32 %v2531_v59, %v2265_v57 }
 0x3f8   : > { %v2532_v47 = vpop.f32.mrb[30].mxu0  ;;  %v1934_v31 = vadd.f32 %v2265_v57, %v1933_v29 }
 0x3f9   : > { %v1945_v4 = vadd.f32 %v2532_v47, %v2265_v57  ;;  %v1936_v30 = vpop.f32.mrb[31].mxu0 }
 0x3fa   : > { %v1937_v5 = vadd.f32 %v2265_v57, %v1936_v30  ;;  %2585 = vmatpush3.bf16.msra.mxu1 %v2584_v16 }
 0x3fb   : > { %v2590_v38 = vpack.c.bf16 %v1945_v4, %v1942_v28  ;;  %2586 = vmatprep.subr.bf16.mxu1 %v2913_v20 }
 0x3fc   : > { %v2587_v33 = vpack.c.bf16 %v1937_v5, %v1934_v31 }
 0x3fe   : > { %2588 = vmatpush3.bf16.msra.mxu1 %v2587_v33 }
 0x3ff   : > { %2589 = vmatprep.subr.bf16.mxu1 %v2913_v20 }
 0x402   : > { %2591 = vmatpush3.bf16.msra.mxu1 %v2590_v38 }
 0x405   : > { %2566 = vmatmul.mubr.msk.f32.vlgmr.msra.gmra.mrb[16].mxu1 %vm1955_vm14, %v2916_v41 }
 0x4d8   : > { %v2024_v37 = vpop.f32.mrb[16].mxu1 }
 0x4d9   : > { %2028 = vst [vmem:[%s486_s16] sm:$0xff] %v2024_v37  ;;  %v2567_v39 = vpop.f32.mrb[17].mxu1 }
 0x4da PF: > { %s3765_s13 = sld [smem:[#allocation7_spill]]  ;;  %s2278_s26 = sshll.u32 %s2897_s25, 7 }
 0x4db   : > { %s3767_s0 = sld [smem:[#allocation19_spill]]  ;;  %s2043_s11 = sshll.u32 %s486_s16, 4  ;;  %s2044_s11 = int_to_ptr.vmem [resolvable:$true] %s2043_s11 }
 0x4dc   : > { %s2815_s27 = scalar_lea.vmem %s2044_s11, 128  ;;  %s2917_s28 = smov [#allocation3]  }
 0x4dd   : > { %p2816_p5 = scmp.ne.s32.totalorder %s2044_s11, %s2815_s27  ;;  %s2819_s15 = sshll.u32 %s2917_s28, 4  ;;  %s2820_s15 = int_to_ptr.vmem [resolvable:$false] %s2819_s15 }
 0x4de   : > { %s2821_s20 = scalar_lea.vmem %s2820_s15, 256  ;;  %p2822_p8 = scmp.lt.s32.totalorder %s2044_s11, %s2820_s15 }
 0x4df   : > { %p2817_p6 = pnand %p2816_p5, %p3032_p3  ;;  %p2823_p10 = scmp.lt.s32.totalorder %s2821_s20, %s2815_s27 }
 0x4e0   : > { %s3768_s23 = sand.u32 1, %s3765_s13  }
 0x4e1   : > { %s3623_s12 = scalar_lea.hbm %s3767_s0, %s2278_s26  ;;  %s2030_s22 = scalar_lea.sflag [#allocation4], %s3768_s23 }
 0x4e2   : > { %p2818_p7 = pneg %p2817_p6  ;;  %p2824_p11 = por %p2823_p10, %p2822_p8 }
 0x4e4   : > { %p2825_p12 = pnand %p2824_p11, %p2818_p7 }
 0x4e6   : > { %2828 = shalt.err (!%p2825_p12)
}
 0x4e7   : > { %s2829_s25 = scalar_lea.hbm %s3623_s12, 128  ;;  %s2833_s17 = scalar_lea.hbm %s3767_s0, 256 }
 0x4e8   : > { %p2830_p13 = scmp.ne.s32.totalorder %s3623_s12, %s2829_s25  ;;  %p2834_p2 = scmp.lt.u32.totalorder %s3623_s12, %s3767_s0 }
 0x4e9   : > { %p2835_p4 = scmp.lt.u32.totalorder %s2833_s17, %s2829_s25  ;;  %p2837_p6 = scmp.lt.u32.totalorder %s2829_s25, %s3623_s12 }
 0x4ea   : > { %p2831_p0 = pnand %p2830_p13, %p3032_p3 }
 0x4eb   : > { %p2836_p5 = por %p2835_p4, %p2834_p2 }
 0x4ec   : > { %p2832_p1 = pneg %p2831_p0 }
 0x4ed   : > { %p2838_p7 = por %p2837_p6, %p2836_p5 }
 0x4ef   : > { %p2839_p8 = pnand %p2838_p7, %p2832_p1 }
 0x4f1   : > { %2842 = shalt.err (!%p2839_p8)
}
 0x4f2   : > { %2608 = dma.vmem_to_hbm [thread:$0]  (%p3032_p3), %s2044_s11, 128, %s3623_s12, %s2030_s22  }
 0x4f3 PF: > { %s3769_s24 = sld [smem:[#allocation11_spill]]  ;;  %s3770_s13 = sld [smem:[#allocation6_spill]] }
 0x4f9   : > { %p2614_p10 = scmp.ge.s32.totalorder %s3769_s24, 2  ;;  %s2055_s19 = sand.u32 1, %s3770_s13  }
 0x4fa   : > { %s2056_s21 = scalar_lea.sflag [#allocation4], %s2055_s19 }
 0x4fb   : > { %p2611_p11 = pnand %p2614_p10, %p3042_p9 }
 0x4fd   : > { %2876 = dma.done.wait (!%p2611_p11), %s2056_s21, 128  }
 0x4fe   : > { %2878 = vsyncadd (!%p2611_p11), %s2056_s21, 4294967168  ;;  %s25_s28 = sadd.s32 1, %s3769_s24   ;;  %s3772_s21 = sld [smem:[#allocation7_spill]] }
 0x4ff   : > { %p22_p12 = scmp.ge.s32.totalorder %s25_s28, 6   ;;  %s3773_s22 = sld [smem:[#allocation8_spill]] }
 0x500   : > { %s3774_s23 = sld [smem:[#allocation16_spill]]  ;;  %s3775_s24 = sld [smem:[#allocation9_spill]] }
 0x501   : > { %s3776_s25 = sld [smem:[#allocation10_spill]]  ;;  %s3777_s26 = sld [smem:[#allocation12_spill]] }
 0x502   : > { %s3778_s27 = sld [smem:[#allocation14_spill]]  ;;  %24 = sbr.rel (!%p22_p12) target bundleno = 9 (0x9), region = 126 }
 0x509   :  { %2061 = vsyncpa [#allocation4], 1 }
 0x50a   :  { %2063 = vsyncpa [#allocation4 + $0x1], 1 }

</bundles_post_ra>
